<compile_context>
chip_gen: v6e
topology: v6e:2x2x1
jax: 0.10.0
libtpu: 0.0.40
codegen_flags: <defaults>
</compile_context>

<pallas_src>
import jax
import jax.numpy as jnp
import numpy as np
from jax.experimental import pallas as pl
from jax.experimental.pallas import tpu as pltpu

_LANE = 128     # lane width (last dim)
_SUBLANE = 8    # sublane width (second-to-last dim)


def _round_up(v, m):
    return ((v + m - 1) // m) * m


# --------------------------- fused chunked recurrence kernel ---------------------------

def _make_fused_kernel(tc, B, Ip, Hp, unroll):
    """One grid step processes one chunk of `tc` time steps."""

    def kernel(x_ref, h0_ref, wi_ref, wh_ref, bi_ref, bhn_ref, wm_ref, bm_ref,
               y_ref, hlast_ref, h_state, g_buf, h_buf):
        # Initialise the persistent hidden state from h0 on the first chunk only.
        @pl.when(pl.program_id(0) == 0)
        def _():
            h_state[...] = h0_ref[...].astype(jnp.float32)

        x_chunk = x_ref[...].astype(jnp.float32)                       # (tc, B, Ip)

        # 1) hoisted (chunk-level) input projection; bi already holds b_ih + [b_hr,b_hz,0].
        g_buf[...] = (
            jnp.dot(x_chunk.reshape(tc * B, Ip), wi_ref[...],
                    preferred_element_type=jnp.float32)
            + bi_ref[...]).reshape(tc, B, 3 * Hp)

        wh = wh_ref[...]                                               # (Hp, 3Hp) resident
        bhn = jnp.broadcast_to(bhn_ref[...], (B, Hp))                  # hoisted out of loop

        # 2) serial recurrence; hidden state carried as a loop value (vreg-resident).
        def step(t, h):
            g_t = g_buf[t]                                             # (B, 3Hp)
            gh = jnp.dot(h, wh, preferred_element_type=jnp.float32)    # (B, 3Hp)
            r = jax.nn.sigmoid(g_t[:, :Hp] + gh[:, :Hp])
            z = jax.nn.sigmoid(g_t[:, Hp:2 * Hp] + gh[:, Hp:2 * Hp])
            n = jnp.tanh(g_t[:, 2 * Hp:] + r * (gh[:, 2 * Hp:] + bhn))
            h_new = (1.0 - z) * n + z * h
            h_buf[t] = h_new
            return h_new

        h_last = jax.lax.fori_loop(0, tc, step, h_state[...], unroll=unroll)
        h_state[...] = h_last                                          # carry to next chunk
        hlast_ref[...] = h_last.astype(hlast_ref.dtype)

        # 3) fused mapping Linear + residual epilogue on the whole chunk.
        y = (jnp.dot(h_buf[...].reshape(tc * B, Hp), wm_ref[...],
                     preferred_element_type=jnp.float32)
             + bm_ref[...] + x_chunk.reshape(tc * B, Ip))
        y_ref[...] = y.reshape(tc, B, Ip).astype(y_ref.dtype)

    return kernel


def _fused_forward(x_p, h0_p, wi, wh, bi, bhn, wm, bm, *, tc):
    T, B, Ip = x_p.shape
    Hp = wh.shape[0]
    n_chunks = T // tc
    unroll = max(1, min(tc, 8))

    return pl.pallas_call(
        _make_fused_kernel(tc, B, Ip, Hp, unroll),
        out_shape=(jax.ShapeDtypeStruct((T, B, Ip), jnp.float32),
                   jax.ShapeDtypeStruct((B, Hp), jnp.float32)),
        grid_spec=pltpu.PrefetchScalarGridSpec(
            num_scalar_prefetch=0,
            grid=(n_chunks,),
            in_specs=[
                pl.BlockSpec((tc, B, Ip), lambda t: (t, 0, 0)),        # x chunk
                pl.BlockSpec((B, Hp), lambda t: (0, 0)),               # h0
                pl.BlockSpec((Ip, 3 * Hp), lambda t: (0, 0)),          # Wi (fused gates)
                pl.BlockSpec((Hp, 3 * Hp), lambda t: (0, 0)),          # Wh (fused gates)
                pl.BlockSpec((1, 3 * Hp), lambda t: (0, 0)),           # bi (b_ih + b_h{r,z})
                pl.BlockSpec((1, Hp), lambda t: (0, 0)),               # b_hn
                pl.BlockSpec((Hp, Ip), lambda t: (0, 0)),              # W_map^T
                pl.BlockSpec((1, Ip), lambda t: (0, 0)),               # b_map
            ],
            out_specs=[
                pl.BlockSpec((tc, B, Ip), lambda t: (t, 0, 0)),        # y chunk
                pl.BlockSpec((B, Hp), lambda t: (0, 0)),               # h_last (resident)
            ],
            scratch_shapes=[
                pltpu.VMEM((B, Hp), jnp.float32),           # persistent hidden state
                pltpu.VMEM((tc, B, 3 * Hp), jnp.float32),   # g chunk (input projection)
                pltpu.VMEM((tc, B, Hp), jnp.float32),       # h chunk (mapping epilogue)
            ],
        ),
        compiler_params=pltpu.CompilerParams(
            dimension_semantics=("arbitrary",)),
    )(x_p, h0_p, wi, wh, bi, bhn, wm, bm)


# ----------------------------------- public wrapper ------------------------------------

def residual_gru(x, h0, w_ih, w_hh, b_ih, b_hh, w_map, b_map, *, time_chunk=32):
    """x: (T, B, I) time-major; h0: (B, H) or None.
    w_ih: (3H, I), w_hh: (3H, H), b_ih/b_hh: (3H,) in PyTorch gate order [r; z; n].
    w_map: (I, H), b_map: (I,).
    Returns (y + x) of shape (T, B, I) and final hidden of shape (1, B, H)."""
    T, B, I = x.shape
    H = w_hh.shape[1]
    f32 = jnp.float32
    if h0 is None:
        h0 = jnp.zeros((B, H), f32)

    # Lane/sublane-aligned padded sizes (zero-padding is semantics-preserving: padded
    # hidden units start at 0 and stay at 0; padded batch rows / input cols are sliced off).
    Ip = _round_up(I, _LANE)
    Hp = _round_up(H, _LANE)
    Bp = _round_up(B, _SUBLANE)

    # Largest time-chunk that divides T (grid iterates chunks; VMEM use ~ tc, not T).
    tc = max(1, min(time_chunk, T))
    while T % tc:
        tc -= 1

    # ---- host-side weight packing (plain-JAX glue): fuse gates, transpose, lane-pad ----
    wi = jnp.zeros((Ip, 3 * Hp), f32)
    wh = jnp.zeros((Hp, 3 * Hp), f32)
    bi = jnp.zeros((1, 3 * Hp), f32)
    for g in range(3):
        wi = wi.at[:I, g * Hp:g * Hp + H].set(w_ih[g * H:(g + 1) * H, :].T.astype(f32))
        wh = wh.at[:H, g * Hp:g * Hp + H].set(w_hh[g * H:(g + 1) * H, :].T.astype(f32))
        bias_g = b_ih[g * H:(g + 1) * H]
        if g < 2:                           # fold b_hr / b_hz into the input-side bias
            bias_g = bias_g + b_hh[g * H:(g + 1) * H]
        bi = bi.at[0, g * Hp:g * Hp + H].set(bias_g.astype(f32))
    bhn = jnp.zeros((1, Hp), f32).at[0, :H].set(b_hh[2 * H:].astype(f32))   # stays in r*(...)
    wm = jnp.zeros((Hp, Ip), f32).at[:H, :I].set(w_map.T.astype(f32))
    bm = jnp.zeros((1, Ip), f32).at[0, :I].set(b_map.astype(f32))

    x_p = jnp.zeros((T, Bp, Ip), f32).at[:, :B, :I].set(x.astype(f32))
    h0_p = jnp.zeros((Bp, Hp), f32).at[:B, :H].set(h0.astype(f32))

    y_p, h_last_p = _fused_forward(x_p, h0_p, wi, wh, bi, bhn, wm, bm, tc=tc)

    y = y_p[:, :B, :I].astype(x.dtype)
    h_last = h_last_p[:B, :H][None].astype(x.dtype)
    return y, h_last


# ------------------------------------- reference ---------------------------------------

def _reference(x, h0, w_ih, w_hh, b_ih, b_hh, w_map, b_map):
    """Pure-JAX reference matching torch.nn.GRU + Linear + residual."""
    H = w_hh.shape[1]

    def step(h, xt):
        gi = xt @ w_ih.T + b_ih
        gh = h @ w_hh.T + b_hh
        r = jax.nn.sigmoid(gi[:, :H] + gh[:, :H])
        z = jax.nn.sigmoid(gi[:, H:2 * H] + gh[:, H:2 * H])
        n = jnp.tanh(gi[:, 2 * H:] + r * gh[:, 2 * H:])
        h_new = (1.0 - z) * n + z * h
        return h_new, h_new

    h_last, hs = jax.lax.scan(step, h0, x)
    y = hs @ w_map.T + b_map
    return y + x, h_last[None]


if __name__ == "__main__":
    T, B, I, H = 8, 2, 16, 32   # seq=8, batch=2, input_size=16, hidden_size=32
    key = jax.random.PRNGKey(0)
    ks = jax.random.split(key, 8)

    def init(k, shape, scale=0.1):
        return jax.random.normal(k, shape, jnp.float32) * scale

    # Deterministic synthetic parameters (PyTorch shapes: GRU + Linear(hidden, input)).
    w_ih = init(ks[0], (3 * H, I))
    w_hh = init(ks[1], (3 * H, H))
    b_ih = init(ks[2], (3 * H,))
    b_hh = init(ks[3], (3 * H,))
    w_map = init(ks[4], (I, H))
    b_map = init(ks[5], (I,))

    x = jax.random.normal(ks[6], (T, B, I), jnp.float32)
    h0 = jax.random.normal(ks[7], (B, H), jnp.float32)

    # time_chunk=4 -> 2 chunks, exercising the persistent hidden-state carry across grid steps.
    y_out, h_out = residual_gru(x, h0, w_ih, w_hh, b_ih, b_hh, w_map, b_map, time_chunk=4)
    jax.block_until_ready((y_out, h_out))

    y_ref, h_ref = _reference(x, h0, w_ih, w_hh, b_ih, b_hh, w_map, b_map)
    np.testing.assert_allclose(np.asarray(y_out), np.asarray(y_ref), atol=1e-5, rtol=1e-5)
    np.testing.assert_allclose(np.asarray(h_out), np.asarray(h_ref), atol=1e-5, rtol=1e-5)

    print("KERNEL_OK")
</pallas_src>

<mosaic_0001>
module attributes {stable_mosaic.version = 11 : i64} {
  func.func @kernel(%arg0: i32, %arg1: memref<4x8x128xf32, #tpu.memory_space<vmem>>, %arg2: memref<8x128xf32, #tpu.memory_space<vmem>>, %arg3: memref<128x384xf32, #tpu.memory_space<vmem>>, %arg4: memref<128x384xf32, #tpu.memory_space<vmem>>, %arg5: memref<1x384xf32, #tpu.memory_space<vmem>>, %arg6: memref<1x128xf32, #tpu.memory_space<vmem>>, %arg7: memref<128x128xf32, #tpu.memory_space<vmem>>, %arg8: memref<1x128xf32, #tpu.memory_space<vmem>>, %arg9: memref<4x8x128xf32, #tpu.memory_space<vmem>>, %arg10: memref<8x128xf32, #tpu.memory_space<vmem>>, %arg11: memref<8x128xf32, #tpu.memory_space<vmem>>, %arg12: memref<4x8x384xf32, #tpu.memory_space<vmem>>, %arg13: memref<4x8x128xf32, #tpu.memory_space<vmem>>) attributes {dimension_semantics = [#tpu.dimension_semantics<arbitrary>], iteration_bounds = array<i64: 2>, scalar_prefetch = 0 : i64, scratch_operands = 3 : i64, tpu.core_type = #tpu.core_type<tc>, window_params = [{transform_indices = @transform_0, window_bounds = array<i64: 4, 8, 128>}, {pipeline_mode = #tpu.pipeline_mode<synchronous>, transform_indices = @transform_1, window_bounds = array<i64: 8, 128>}, {pipeline_mode = #tpu.pipeline_mode<synchronous>, transform_indices = @transform_2, window_bounds = array<i64: 128, 384>}, {pipeline_mode = #tpu.pipeline_mode<synchronous>, transform_indices = @transform_3, window_bounds = array<i64: 128, 384>}, {pipeline_mode = #tpu.pipeline_mode<synchronous>, transform_indices = @transform_4, window_bounds = array<i64: 1, 384>}, {pipeline_mode = #tpu.pipeline_mode<synchronous>, transform_indices = @transform_5, window_bounds = array<i64: 1, 128>}, {pipeline_mode = #tpu.pipeline_mode<synchronous>, transform_indices = @transform_6, window_bounds = array<i64: 128, 128>}, {pipeline_mode = #tpu.pipeline_mode<synchronous>, transform_indices = @transform_7, window_bounds = array<i64: 1, 128>}, {transform_indices = @transform_8, window_bounds = array<i64: 4, 8, 128>}, {pipeline_mode = #tpu.pipeline_mode<synchronous>, transform_indices = @transform_9, window_bounds = array<i64: 8, 128>}]} {
    %c0_i32 = arith.constant 0 : i32
    %0 = arith.cmpi eq, %arg0, %c0_i32 : i32
    %1 = arith.extui %0 : i1 to i32
    %c0_i32_0 = arith.constant 0 : i32
    %2 = arith.cmpi ne, %1, %c0_i32_0 : i32
    scf.if %2 {
      %c0_64 = arith.constant 0 : index
      %c0_65 = arith.constant 0 : index
      %170 = vector.load %arg2[%c0_64, %c0_65] : memref<8x128xf32, #tpu.memory_space<vmem>>, vector<8x128xf32>
      %c0_66 = arith.constant 0 : index
      %c0_67 = arith.constant 0 : index
      %171 = vector.load %arg11[%c0_66, %c0_67] : memref<8x128xf32, #tpu.memory_space<vmem>>, vector<8x128xf32>
      tpu.vector_store %arg11[%c0_66, %c0_67], %170 {strides = array<i32>} : memref<8x128xf32, #tpu.memory_space<vmem>>, vector<8x128xf32>,
    } else {
    }
    %c0 = arith.constant 0 : index
    %c0_1 = arith.constant 0 : index
    %c0_2 = arith.constant 0 : index
    %3 = vector.load %arg1[%c0, %c0_1, %c0_2] : memref<4x8x128xf32, #tpu.memory_space<vmem>>, vector<4x8x128xf32>
    %4 = vector.shape_cast %3 : vector<4x8x128xf32> to vector<32x128xf32>
    %c0_3 = arith.constant 0 : index
    %c0_4 = arith.constant 0 : index
    %5 = vector.load %arg3[%c0_3, %c0_4] : memref<128x384xf32, #tpu.memory_space<vmem>>, vector<128x384xf32>
    %cst = arith.constant dense<0.000000e+00> : vector<32x384xf32>
    %6 = tpu.matmul %4, %5, %cst {dimension_numbers = #tpu.dot_dimension_numbers<[1], [0], [0], [1], [0, 0, 1, 1], [], []>} : vector<32x128xf32>, vector<128x384xf32>, vector<32x384xf32> -> vector<32x384xf32>
    %c0_5 = arith.constant 0 : index
    %c0_6 = arith.constant 0 : index
    %7 = vector.load %arg5[%c0_5, %c0_6] : memref<1x384xf32, #tpu.memory_space<vmem>>, vector<1x384xf32>
    %8 = vector.broadcast %7 : vector<1x384xf32> to vector<32x384xf32>
    %9 = arith.addf %6, %8 : vector<32x384xf32>
    %10 = vector.shape_cast %9 : vector<32x384xf32> to vector<4x8x384xf32>
    %c0_7 = arith.constant 0 : index
    %c0_8 = arith.constant 0 : index
    %c0_9 = arith.constant 0 : index
    %11 = vector.load %arg12[%c0_7, %c0_8, %c0_9] : memref<4x8x384xf32, #tpu.memory_space<vmem>>, vector<4x8x384xf32>
    tpu.vector_store %arg12[%c0_7, %c0_8, %c0_9], %10 {strides = array<i32>} : memref<4x8x384xf32, #tpu.memory_space<vmem>>, vector<4x8x384xf32>,
    %c0_10 = arith.constant 0 : index
    %c0_11 = arith.constant 0 : index
    %12 = vector.load %arg4[%c0_10, %c0_11] : memref<128x384xf32, #tpu.memory_space<vmem>>, vector<128x384xf32>
    %c0_12 = arith.constant 0 : index
    %c0_13 = arith.constant 0 : index
    %13 = vector.load %arg6[%c0_12, %c0_13] : memref<1x128xf32, #tpu.memory_space<vmem>>, vector<1x128xf32>
    %14 = vector.shape_cast %13 : vector<1x128xf32> to vector<1x128xf32>
    %15 = vector.broadcast %14 : vector<1x128xf32> to vector<8x128xf32>
    %c0_14 = arith.constant 0 : index
    %c0_15 = arith.constant 0 : index
    %16 = vector.load %arg11[%c0_14, %c0_15] : memref<8x128xf32, #tpu.memory_space<vmem>>, vector<8x128xf32>
    %c0_i32_16 = arith.constant 0 : i32
    %17 = arith.index_cast %c0_i32_16 : i32 to index
    %c0_17 = arith.constant 0 : index
    %c0_18 = arith.constant 0 : index
    %18 = vector.load %arg12[%17, %c0_17, %c0_18] : memref<4x8x384xf32, #tpu.memory_space<vmem>>, vector<1x8x384xf32>
    %19 = vector.shape_cast %18 : vector<1x8x384xf32> to vector<8x384xf32>
    %cst_19 = arith.constant dense<0.000000e+00> : vector<8x384xf32>
    %20 = tpu.matmul %16, %12, %cst_19 {dimension_numbers = #tpu.dot_dimension_numbers<[1], [0], [0], [1], [0, 0, 1, 1], [], []>} : vector<8x128xf32>, vector<128x384xf32>, vector<8x384xf32> -> vector<8x384xf32>
    %21 = vector.extract_strided_slice %19 {offsets = [0, 0], sizes = [8, 128], strides = [1, 1]} : vector<8x384xf32> to vector<8x128xf32>
    %22 = vector.extract_strided_slice %20 {offsets = [0, 0], sizes = [8, 128], strides = [1, 1]} : vector<8x384xf32> to vector<8x128xf32>
    %23 = arith.addf %21, %22 : vector<8x128xf32>
    %24 = arith.negf %23 : vector<8x128xf32>
    %25 = math.exp %24 : vector<8x128xf32>
    %cst_20 = arith.constant 1.000000e+00 : f32
    %26 = vector.broadcast %cst_20 : f32 to vector<8x128xf32>
    %27 = arith.addf %26, %25 : vector<8x128xf32>
    %28 = arith.divf %26, %27 : vector<8x128xf32>
    %29 = vector.extract_strided_slice %19 {offsets = [0, 128], sizes = [8, 128], strides = [1, 1]} : vector<8x384xf32> to vector<8x128xf32>
    %30 = vector.extract_strided_slice %20 {offsets = [0, 128], sizes = [8, 128], strides = [1, 1]} : vector<8x384xf32> to vector<8x128xf32>
    %31 = arith.addf %29, %30 : vector<8x128xf32>
    %32 = arith.negf %31 : vector<8x128xf32>
    %33 = math.exp %32 : vector<8x128xf32>
    %cst_21 = arith.constant 1.000000e+00 : f32
    %34 = vector.broadcast %cst_21 : f32 to vector<8x128xf32>
    %35 = arith.addf %34, %33 : vector<8x128xf32>
    %36 = arith.divf %34, %35 : vector<8x128xf32>
    %37 = vector.extract_strided_slice %19 {offsets = [0, 256], sizes = [8, 128], strides = [1, 1]} : vector<8x384xf32> to vector<8x128xf32>
    %38 = vector.extract_strided_slice %20 {offsets = [0, 256], sizes = [8, 128], strides = [1, 1]} : vector<8x384xf32> to vector<8x128xf32>
    %39 = arith.addf %38, %15 : vector<8x128xf32>
    %40 = arith.mulf %28, %39 : vector<8x128xf32>
    %41 = arith.addf %37, %40 : vector<8x128xf32>
    %42 = math.tanh %41 : vector<8x128xf32>
    %cst_22 = arith.constant 1.000000e+00 : f32
    %43 = vector.broadcast %cst_22 : f32 to vector<8x128xf32>
    %44 = arith.subf %43, %36 : vector<8x128xf32>
    %45 = arith.mulf %44, %42 : vector<8x128xf32>
    %46 = arith.mulf %36, %16 : vector<8x128xf32>
    %47 = arith.addf %45, %46 : vector<8x128xf32>
    %48 = arith.index_cast %c0_i32_16 : i32 to index
    %c0_23 = arith.constant 0 : index
    %c0_24 = arith.constant 0 : index
    %49 = vector.load %arg13[%48, %c0_23, %c0_24] : memref<4x8x128xf32, #tpu.memory_space<vmem>>, vector<1x8x128xf32>
    %50 = vector.shape_cast %49 : vector<1x8x128xf32> to vector<8x128xf32>
    %51 = vector.shape_cast %47 : vector<8x128xf32> to vector<1x8x128xf32>
    tpu.vector_store %arg13[%48, %c0_23, %c0_24], %51 {strides = array<i32>} : memref<4x8x128xf32, #tpu.memory_space<vmem>>, vector<1x8x128xf32>,
    %c1_i32 = arith.constant 1 : i32
    %52 = arith.index_cast %c1_i32 : i32 to index
    %c0_25 = arith.constant 0 : index
    %c0_26 = arith.constant 0 : index
    %53 = vector.load %arg12[%52, %c0_25, %c0_26] : memref<4x8x384xf32, #tpu.memory_space<vmem>>, vector<1x8x384xf32>
    %54 = vector.shape_cast %53 : vector<1x8x384xf32> to vector<8x384xf32>
    %cst_27 = arith.constant dense<0.000000e+00> : vector<8x384xf32>
    %55 = tpu.matmul %47, %12, %cst_27 {dimension_numbers = #tpu.dot_dimension_numbers<[1], [0], [0], [1], [0, 0, 1, 1], [], []>} : vector<8x128xf32>, vector<128x384xf32>, vector<8x384xf32> -> vector<8x384xf32>
    %56 = vector.extract_strided_slice %54 {offsets = [0, 0], sizes = [8, 128], strides = [1, 1]} : vector<8x384xf32> to vector<8x128xf32>
    %57 = vector.extract_strided_slice %55 {offsets = [0, 0], sizes = [8, 128], strides = [1, 1]} : vector<8x384xf32> to vector<8x128xf32>
    %58 = arith.addf %56, %57 : vector<8x128xf32>
    %59 = arith.negf %58 : vector<8x128xf32>
    %60 = math.exp %59 : vector<8x128xf32>
    %cst_28 = arith.constant 1.000000e+00 : f32
    %61 = vector.broadcast %cst_28 : f32 to vector<8x128xf32>
    %62 = arith.addf %61, %60 : vector<8x128xf32>
    %63 = arith.divf %61, %62 : vector<8x128xf32>
    %64 = vector.extract_strided_slice %54 {offsets = [0, 128], sizes = [8, 128], strides = [1, 1]} : vector<8x384xf32> to vector<8x128xf32>
    %65 = vector.extract_strided_slice %55 {offsets = [0, 128], sizes = [8, 128], strides = [1, 1]} : vector<8x384xf32> to vector<8x128xf32>
    %66 = arith.addf %64, %65 : vector<8x128xf32>
    %67 = arith.negf %66 : vector<8x128xf32>
    %68 = math.exp %67 : vector<8x128xf32>
    %cst_29 = arith.constant 1.000000e+00 : f32
    %69 = vector.broadcast %cst_29 : f32 to vector<8x128xf32>
    %70 = arith.addf %69, %68 : vector<8x128xf32>
    %71 = arith.divf %69, %70 : vector<8x128xf32>
    %72 = vector.extract_strided_slice %54 {offsets = [0, 256], sizes = [8, 128], strides = [1, 1]} : vector<8x384xf32> to vector<8x128xf32>
    %73 = vector.extract_strided_slice %55 {offsets = [0, 256], sizes = [8, 128], strides = [1, 1]} : vector<8x384xf32> to vector<8x128xf32>
    %74 = arith.addf %73, %15 : vector<8x128xf32>
    %75 = arith.mulf %63, %74 : vector<8x128xf32>
    %76 = arith.addf %72, %75 : vector<8x128xf32>
    %77 = math.tanh %76 : vector<8x128xf32>
    %cst_30 = arith.constant 1.000000e+00 : f32
    %78 = vector.broadcast %cst_30 : f32 to vector<8x128xf32>
    %79 = arith.subf %78, %71 : vector<8x128xf32>
    %80 = arith.mulf %79, %77 : vector<8x128xf32>
    %81 = arith.mulf %71, %47 : vector<8x128xf32>
    %82 = arith.addf %80, %81 : vector<8x128xf32>
    %83 = arith.index_cast %c1_i32 : i32 to index
    %c0_31 = arith.constant 0 : index
    %c0_32 = arith.constant 0 : index
    %84 = vector.load %arg13[%83, %c0_31, %c0_32] : memref<4x8x128xf32, #tpu.memory_space<vmem>>, vector<1x8x128xf32>
    %85 = vector.shape_cast %84 : vector<1x8x128xf32> to vector<8x128xf32>
    %86 = vector.shape_cast %82 : vector<8x128xf32> to vector<1x8x128xf32>
    tpu.vector_store %arg13[%83, %c0_31, %c0_32], %86 {strides = array<i32>} : memref<4x8x128xf32, #tpu.memory_space<vmem>>, vector<1x8x128xf32>,
    %c2_i32 = arith.constant 2 : i32
    %87 = arith.index_cast %c2_i32 : i32 to index
    %c0_33 = arith.constant 0 : index
    %c0_34 = arith.constant 0 : index
    %88 = vector.load %arg12[%87, %c0_33, %c0_34] : memref<4x8x384xf32, #tpu.memory_space<vmem>>, vector<1x8x384xf32>
    %89 = vector.shape_cast %88 : vector<1x8x384xf32> to vector<8x384xf32>
    %cst_35 = arith.constant dense<0.000000e+00> : vector<8x384xf32>
    %90 = tpu.matmul %82, %12, %cst_35 {dimension_numbers = #tpu.dot_dimension_numbers<[1], [0], [0], [1], [0, 0, 1, 1], [], []>} : vector<8x128xf32>, vector<128x384xf32>, vector<8x384xf32> -> vector<8x384xf32>
    %91 = vector.extract_strided_slice %89 {offsets = [0, 0], sizes = [8, 128], strides = [1, 1]} : vector<8x384xf32> to vector<8x128xf32>
    %92 = vector.extract_strided_slice %90 {offsets = [0, 0], sizes = [8, 128], strides = [1, 1]} : vector<8x384xf32> to vector<8x128xf32>
    %93 = arith.addf %91, %92 : vector<8x128xf32>
    %94 = arith.negf %93 : vector<8x128xf32>
    %95 = math.exp %94 : vector<8x128xf32>
    %cst_36 = arith.constant 1.000000e+00 : f32
    %96 = vector.broadcast %cst_36 : f32 to vector<8x128xf32>
    %97 = arith.addf %96, %95 : vector<8x128xf32>
    %98 = arith.divf %96, %97 : vector<8x128xf32>
    %99 = vector.extract_strided_slice %89 {offsets = [0, 128], sizes = [8, 128], strides = [1, 1]} : vector<8x384xf32> to vector<8x128xf32>
    %100 = vector.extract_strided_slice %90 {offsets = [0, 128], sizes = [8, 128], strides = [1, 1]} : vector<8x384xf32> to vector<8x128xf32>
    %101 = arith.addf %99, %100 : vector<8x128xf32>
    %102 = arith.negf %101 : vector<8x128xf32>
    %103 = math.exp %102 : vector<8x128xf32>
    %cst_37 = arith.constant 1.000000e+00 : f32
    %104 = vector.broadcast %cst_37 : f32 to vector<8x128xf32>
    %105 = arith.addf %104, %103 : vector<8x128xf32>
    %106 = arith.divf %104, %105 : vector<8x128xf32>
    %107 = vector.extract_strided_slice %89 {offsets = [0, 256], sizes = [8, 128], strides = [1, 1]} : vector<8x384xf32> to vector<8x128xf32>
    %108 = vector.extract_strided_slice %90 {offsets = [0, 256], sizes = [8, 128], strides = [1, 1]} : vector<8x384xf32> to vector<8x128xf32>
    %109 = arith.addf %108, %15 : vector<8x128xf32>
    %110 = arith.mulf %98, %109 : vector<8x128xf32>
    %111 = arith.addf %107, %110 : vector<8x128xf32>
    %112 = math.tanh %111 : vector<8x128xf32>
    %cst_38 = arith.constant 1.000000e+00 : f32
    %113 = vector.broadcast %cst_38 : f32 to vector<8x128xf32>
    %114 = arith.subf %113, %106 : vector<8x128xf32>
    %115 = arith.mulf %114, %112 : vector<8x128xf32>
    %116 = arith.mulf %106, %82 : vector<8x128xf32>
    %117 = arith.addf %115, %116 : vector<8x128xf32>
    %118 = arith.index_cast %c2_i32 : i32 to index
    %c0_39 = arith.constant 0 : index
    %c0_40 = arith.constant 0 : index
    %119 = vector.load %arg13[%118, %c0_39, %c0_40] : memref<4x8x128xf32, #tpu.memory_space<vmem>>, vector<1x8x128xf32>
    %120 = vector.shape_cast %119 : vector<1x8x128xf32> to vector<8x128xf32>
    %121 = vector.shape_cast %117 : vector<8x128xf32> to vector<1x8x128xf32>
    tpu.vector_store %arg13[%118, %c0_39, %c0_40], %121 {strides = array<i32>} : memref<4x8x128xf32, #tpu.memory_space<vmem>>, vector<1x8x128xf32>,
    %c3_i32 = arith.constant 3 : i32
    %122 = arith.index_cast %c3_i32 : i32 to index
    %c0_41 = arith.constant 0 : index
    %c0_42 = arith.constant 0 : index
    %123 = vector.load %arg12[%122, %c0_41, %c0_42] : memref<4x8x384xf32, #tpu.memory_space<vmem>>, vector<1x8x384xf32>
    %124 = vector.shape_cast %123 : vector<1x8x384xf32> to vector<8x384xf32>
    %cst_43 = arith.constant dense<0.000000e+00> : vector<8x384xf32>
    %125 = tpu.matmul %117, %12, %cst_43 {dimension_numbers = #tpu.dot_dimension_numbers<[1], [0], [0], [1], [0, 0, 1, 1], [], []>} : vector<8x128xf32>, vector<128x384xf32>, vector<8x384xf32> -> vector<8x384xf32>
    %126 = vector.extract_strided_slice %124 {offsets = [0, 0], sizes = [8, 128], strides = [1, 1]} : vector<8x384xf32> to vector<8x128xf32>
    %127 = vector.extract_strided_slice %125 {offsets = [0, 0], sizes = [8, 128], strides = [1, 1]} : vector<8x384xf32> to vector<8x128xf32>
    %128 = arith.addf %126, %127 : vector<8x128xf32>
    %129 = arith.negf %128 : vector<8x128xf32>
    %130 = math.exp %129 : vector<8x128xf32>
    %cst_44 = arith.constant 1.000000e+00 : f32
    %131 = vector.broadcast %cst_44 : f32 to vector<8x128xf32>
    %132 = arith.addf %131, %130 : vector<8x128xf32>
    %133 = arith.divf %131, %132 : vector<8x128xf32>
    %134 = vector.extract_strided_slice %124 {offsets = [0, 128], sizes = [8, 128], strides = [1, 1]} : vector<8x384xf32> to vector<8x128xf32>
    %135 = vector.extract_strided_slice %125 {offsets = [0, 128], sizes = [8, 128], strides = [1, 1]} : vector<8x384xf32> to vector<8x128xf32>
    %136 = arith.addf %134, %135 : vector<8x128xf32>
    %137 = arith.negf %136 : vector<8x128xf32>
    %138 = math.exp %137 : vector<8x128xf32>
    %cst_45 = arith.constant 1.000000e+00 : f32
    %139 = vector.broadcast %cst_45 : f32 to vector<8x128xf32>
    %140 = arith.addf %139, %138 : vector<8x128xf32>
    %141 = arith.divf %139, %140 : vector<8x128xf32>
    %142 = vector.extract_strided_slice %124 {offsets = [0, 256], sizes = [8, 128], strides = [1, 1]} : vector<8x384xf32> to vector<8x128xf32>
    %143 = vector.extract_strided_slice %125 {offsets = [0, 256], sizes = [8, 128], strides = [1, 1]} : vector<8x384xf32> to vector<8x128xf32>
    %144 = arith.addf %143, %15 : vector<8x128xf32>
    %145 = arith.mulf %133, %144 : vector<8x128xf32>
    %146 = arith.addf %142, %145 : vector<8x128xf32>
    %147 = math.tanh %146 : vector<8x128xf32>
    %cst_46 = arith.constant 1.000000e+00 : f32
    %148 = vector.broadcast %cst_46 : f32 to vector<8x128xf32>
    %149 = arith.subf %148, %141 : vector<8x128xf32>
    %150 = arith.mulf %149, %147 : vector<8x128xf32>
    %151 = arith.mulf %141, %117 : vector<8x128xf32>
    %152 = arith.addf %150, %151 : vector<8x128xf32>
    %153 = arith.index_cast %c3_i32 : i32 to index
    %c0_47 = arith.constant 0 : index
    %c0_48 = arith.constant 0 : index
    %154 = vector.load %arg13[%153, %c0_47, %c0_48] : memref<4x8x128xf32, #tpu.memory_space<vmem>>, vector<1x8x128xf32>
    %155 = vector.shape_cast %154 : vector<1x8x128xf32> to vector<8x128xf32>
    %156 = vector.shape_cast %152 : vector<8x128xf32> to vector<1x8x128xf32>
    tpu.vector_store %arg13[%153, %c0_47, %c0_48], %156 {strides = array<i32>} : memref<4x8x128xf32, #tpu.memory_space<vmem>>, vector<1x8x128xf32>,
    %c4_i32 = arith.constant 4 : i32
    %c0_49 = arith.constant 0 : index
    %c0_50 = arith.constant 0 : index
    %157 = vector.load %arg11[%c0_49, %c0_50] : memref<8x128xf32, #tpu.memory_space<vmem>>, vector<8x128xf32>
    tpu.vector_store %arg11[%c0_49, %c0_50], %152 {strides = array<i32>} : memref<8x128xf32, #tpu.memory_space<vmem>>, vector<8x128xf32>,
    %c0_51 = arith.constant 0 : index
    %c0_52 = arith.constant 0 : index
    %158 = vector.load %arg10[%c0_51, %c0_52] : memref<8x128xf32, #tpu.memory_space<vmem>>, vector<8x128xf32>
    tpu.vector_store %arg10[%c0_51, %c0_52], %152 {strides = array<i32>} : memref<8x128xf32, #tpu.memory_space<vmem>>, vector<8x128xf32>,
    %c0_53 = arith.constant 0 : index
    %c0_54 = arith.constant 0 : index
    %c0_55 = arith.constant 0 : index
    %159 = vector.load %arg13[%c0_53, %c0_54, %c0_55] : memref<4x8x128xf32, #tpu.memory_space<vmem>>, vector<4x8x128xf32>
    %160 = vector.shape_cast %159 : vector<4x8x128xf32> to vector<32x128xf32>
    %c0_56 = arith.constant 0 : index
    %c0_57 = arith.constant 0 : index
    %161 = vector.load %arg7[%c0_56, %c0_57] : memref<128x128xf32, #tpu.memory_space<vmem>>, vector<128x128xf32>
    %cst_58 = arith.constant dense<0.000000e+00> : vector<32x128xf32>
    %162 = tpu.matmul %160, %161, %cst_58 {dimension_numbers = #tpu.dot_dimension_numbers<[1], [0], [0], [1], [0, 0, 1, 1], [], []>} : vector<32x128xf32>, vector<128x128xf32>, vector<32x128xf32> -> vector<32x128xf32>
    %c0_59 = arith.constant 0 : index
    %c0_60 = arith.constant 0 : index
    %163 = vector.load %arg8[%c0_59, %c0_60] : memref<1x128xf32, #tpu.memory_space<vmem>>, vector<1x128xf32>
    %164 = vector.broadcast %163 : vector<1x128xf32> to vector<32x128xf32>
    %165 = arith.addf %162, %164 : vector<32x128xf32>
    %166 = vector.shape_cast %3 : vector<4x8x128xf32> to vector<32x128xf32>
    %167 = arith.addf %165, %166 : vector<32x128xf32>
    %168 = vector.shape_cast %167 : vector<32x128xf32> to vector<4x8x128xf32>
    %c0_61 = arith.constant 0 : index
    %c0_62 = arith.constant 0 : index
    %c0_63 = arith.constant 0 : index
    %169 = vector.load %arg9[%c0_61, %c0_62, %c0_63] : memref<4x8x128xf32, #tpu.memory_space<vmem>>, vector<4x8x128xf32>
    tpu.vector_store %arg9[%c0_61, %c0_62, %c0_63], %168 {strides = array<i32>} : memref<4x8x128xf32, #tpu.memory_space<vmem>>, vector<4x8x128xf32>,
    return
  }
  func.func @transform_0(%arg0: i32) -> (i32, i32, i32) {
    %c0_i32 = arith.constant 0 : i32
    %c0_i32_0 = arith.constant 0 : i32
    %c0_i32_1 = arith.constant 0 : i32
    return %arg0, %c0_i32, %c0_i32_0 : i32, i32, i32
  }
  func.func @transform_1(%arg0: i32) -> (i32, i32) {
    %c0_i32 = arith.constant 0 : i32
    %c0_i32_0 = arith.constant 0 : i32
    %c0_i32_1 = arith.constant 0 : i32
    return %c0_i32, %c0_i32_0 : i32, i32
  }
  func.func @transform_2(%arg0: i32) -> (i32, i32) {
    %c0_i32 = arith.constant 0 : i32
    %c0_i32_0 = arith.constant 0 : i32
    %c0_i32_1 = arith.constant 0 : i32
    return %c0_i32, %c0_i32_0 : i32, i32
  }
  func.func @transform_3(%arg0: i32) -> (i32, i32) {
    %c0_i32 = arith.constant 0 : i32
    %c0_i32_0 = arith.constant 0 : i32
    %c0_i32_1 = arith.constant 0 : i32
    return %c0_i32, %c0_i32_0 : i32, i32
  }
  func.func @transform_4(%arg0: i32) -> (i32, i32) {
    %c0_i32 = arith.constant 0 : i32
    %c0_i32_0 = arith.constant 0 : i32
    %c0_i32_1 = arith.constant 0 : i32
    return %c0_i32, %c0_i32_0 : i32, i32
  }
  func.func @transform_5(%arg0: i32) -> (i32, i32) {
    %c0_i32 = arith.constant 0 : i32
    %c0_i32_0 = arith.constant 0 : i32
    %c0_i32_1 = arith.constant 0 : i32
    return %c0_i32, %c0_i32_0 : i32, i32
  }
  func.func @transform_6(%arg0: i32) -> (i32, i32) {
    %c0_i32 = arith.constant 0 : i32
    %c0_i32_0 = arith.constant 0 : i32
    %c0_i32_1 = arith.constant 0 : i32
    return %c0_i32, %c0_i32_0 : i32, i32
  }
  func.func @transform_7(%arg0: i32) -> (i32, i32) {
    %c0_i32 = arith.constant 0 : i32
    %c0_i32_0 = arith.constant 0 : i32
    %c0_i32_1 = arith.constant 0 : i32
    return %c0_i32, %c0_i32_0 : i32, i32
  }
  func.func @transform_8(%arg0: i32) -> (i32, i32, i32) {
    %c0_i32 = arith.constant 0 : i32
    %c0_i32_0 = arith.constant 0 : i32
    %c0_i32_1 = arith.constant 0 : i32
    return %arg0, %c0_i32, %c0_i32_0 : i32, i32, i32
  }
  func.func @transform_9(%arg0: i32) -> (i32, i32) {
    %c0_i32 = arith.constant 0 : i32
    %c0_i32_0 = arith.constant 0 : i32
    %c0_i32_1 = arith.constant 0 : i32
    return %c0_i32, %c0_i32_0 : i32, i32
  }
}

</mosaic_0001>

<bundles_post_ra>
// kernel: tpu_custom_call.1
= control target key start
LH: loop header
LB: loop body
LE: loop exit
PB: predicated region body
PF: predicated region fallthrough
CT: control target
= control target key end

     0   :  { %s3162_s0 = inlined_call_operand.hbm [shape: f32[8,8,128], index: 0, kind: input, shape index: {}]   ;;  %s3163_s1 = inlined_call_operand.hbm [shape: f32[8,128], index: 1, kind: input, shape index: {}]   ;;  %s3164_s2 = inlined_call_operand.hbm [shape: f32[128,384], index: 2, kind: input, shape index: {}]   ;;  %s3165_s3 = inlined_call_operand.hbm [shape: f32[128,384], index: 3, kind: input, shape index: {}]   ;;  %s3166_s4 = inlined_call_operand.vmem [shape: f32[1,384], index: 4, kind: input, shape index: {}]   ;;  %s3167_s5 = inlined_call_operand.vmem [shape: f32[1,128], index: 5, kind: input, shape index: {}]   ;;  %s3168_s6 = inlined_call_operand.hbm [shape: f32[128,128], index: 6, kind: input, shape index: {}]   ;;  %s3169_s7 = inlined_call_operand.vmem [shape: f32[1,128], index: 7, kind: input, shape index: {}]   ;;  %s3170_s8 = inlined_call_operand.hbm [shape: f32[8,8,128], index: 8, kind: output, shape index: {0}]   ;;  %s3171_s9 = inlined_call_operand.hbm [shape: f32[8,128], index: 9, kind: output, shape index: {1}]  }
   0x1   :  { %3197 = sst [smem:[#allocation40_spill]] %s3163_s1 }
   0x2   :  { %3198 = sst [smem:[#allocation41_spill]] %s3164_s2 }
   0x3   :  { %3199 = sst [smem:[#allocation42_spill]] %s3165_s3 }
   0x4   :  { %15 = vsyncpa [#allocation6], 0 }
   0x5   :  { %17 = vsyncpa [#allocation6 + $0x1], 0 }
   0x6   :  { %18 = vsyncpa [#allocation9], 0 }
   0x7   :  { %19 = vsyncpa [#allocation12], 0 }
   0x8   :  { %20 = vsyncpa [#allocation7], 0 }
   0x9   :  { %22 = vsyncpa [#allocation7 + $0x1], 0 }
   0xa   :  { %23 = vsyncpa [#allocation16], 0  ;;  %s2472_s30 = smov 0   ;;  %s2474_s10 = smov 0  }
   0xb   :  { %s2476_s11 = smov 0   ;;  %s2478_s12 = smov 0  }
   0xc LB: > { %s2493_s13 = sadd.s32 4294967295, %s2405_s12   ;;  %s1668_s14 = sadd.s32 4294967294, %s2405_s12   ;;  %s2405_s12 = sphi %s2478_s12, %s3270_s12   ;;  %s2401_s11 = sphi %s2476_s11, %s3269_s11   ;;  %s2397_s10 = sphi %s2474_s10, %s3268_s10   ;;  %s2393_s30 = sphi %s2472_s30, %s3267_s30  }
   0xd   : > { %p49_p0 = scmp.ne.s32.totalorder %s2397_s10, %s2393_s30  ;;  %p3172_p1 = scmp.eq.s32.totalorder %s2493_s13, 0 }
   0xe   : > { %p226_p3 = scmp.eq.s32.totalorder %s1668_s14, 1  ;;  %p1669_p5 = scmp.ge.s32.totalorder %s2405_s12, 1 }
   0xf   : > { %p2502_p4 = por %p3172_p1, %p49_p0  ;;  %p254_p7 = scmp.lt.s32.totalorder %s2405_s12, 3 }
  0x10   : > { %p2507_p6 = por %p226_p3, %p49_p0  ;;  %s2407_s18 = smov [#allocation8]  }
  0x11   : > { %s3200_s15 = scalar_select %p2502_p4, 1, 0 }
  0x12   : > { %s3201_s16 = scalar_select %p2507_p6, 1, 0 }
  0x13   : > { %p2513_p9 = pnand %p1669_p5, %p254_p7  ;;  %s267_s19 = sshll.u32 %s2407_s18, 4  ;;  %s268_s19 = int_to_ptr.vmem [resolvable:$true] %s267_s19 }
  0x14   : > { %s2408_s21 = smov [#allocation11]   ;;  %s2409_s23 = smov [#allocation10]  }
  0x15   : > { %s3202_s17 = scalar_select %p2513_p9, 1, 0 }
  0x16   : > { %p2053_p11 = pneg %p2513_p9  ;;  %s290_s22 = sshll.u32 %s2408_s21, 4  ;;  %s291_s22 = int_to_ptr.vmem [resolvable:$true] %s290_s22 }
  0x17   : > { %s277_s24 = sshll.u32 %s2409_s23, 4  ;;  %s2184_s25 = scalar_lea.vmem %s268_s19, 128  ;;  %s278_s24 = int_to_ptr.vmem [resolvable:$true] %s277_s24 }
  0x18   : > { %p2522_p12 = pnand %p2053_p11, %p3172_p1  ;;  %p2185_p0 = scmp.ne.s32.totalorder %s268_s19, %s2184_s25 }
  0x19   : > { %p2192_p7 = scmp.lt.s32.totalorder %s268_s19, %s268_s19  ;;  %p2193_p11 = scmp.lt.s32.totalorder %s2184_s25, %s2184_s25 }
  0x1a   : > { %p2175_p13 = pneg %p2522_p12 }
  0x1b   : > { %p2194_p10 = por %p2193_p11, %p2192_p7 }
  0x1c   : > { %p2187_p3 = pnand %p2185_p0, %p2175_p13 }
  0x1e   : > { %p2188_p5 = pneg %p2187_p3 }
  0x20   : > { %p2195_p8 = pnand %p2194_p10, %p2188_p5 }
  0x22   : > { %2198 = shalt.err (!%p2195_p8)
}
  0x23   : > { %s3204_s1 = sld [smem:[#allocation40_spill]]  ;;  %s2210_s28 = scalar_lea.vmem %s291_s22, 6144 }
  0x24   : > { %p2211_p1 = scmp.ne.s32.totalorder %s291_s22, %s2210_s28  ;;  %p2218_p0 = scmp.lt.s32.totalorder %s291_s22, %s291_s22 }
  0x25   : > { %p2219_p3 = scmp.lt.s32.totalorder %s2210_s28, %s2210_s28 }
  0x26   : > { %p2213_p2 = pnand %p2211_p1, %p2175_p13 }
  0x27   : > { %p2220_p4 = por %p2219_p3, %p2218_p0 }
  0x28   : > { %p2214_p6 = pneg %p2213_p2 }
  0x29   : > { %2056 = dma.hbm_to_vmem [thread:$0]  (!%p2522_p12), %s3204_s1, 128, %s268_s19, [#allocation9]  }
  0x2a   : > { %p2221_p9 = pnand %p2220_p4, %p2214_p6 }
  0x2c   : > { %2224 = shalt.err (!%p2221_p9)
}
  0x2d   : > { %s2410_s29 = smov 384   ;;  %s2411_s14 = smov 24  }
  0x2e   : > { %s3205_s3 = sld [smem:[#allocation42_spill]]  ;;  %s2236_s19 = scalar_lea.vmem %s278_s24, 6144 }
  0x2f   : > { %p2237_p8 = scmp.ne.s32.totalorder %s278_s24, %s2236_s19  ;;  %p2244_p10 = scmp.lt.s32.totalorder %s278_s24, %s278_s24 }
  0x30   : > { %p2245_p5 = scmp.lt.s32.totalorder %s2236_s19, %s2236_s19 }
  0x31   : > { %p2239_p1 = pnand %p2237_p8, %p2175_p13 }
  0x32   : > { %p2246_p4 = por %p2245_p5, %p2244_p10 }
  0x33   : > { %p2240_p2 = pneg %p2239_p1 }
  0x34   : > { %2062 = dma.hbm_to_vmem [thread:$0]  (!%p2522_p12), %s3205_s3, 6144, %s291_s22, [#allocation12], %s2410_s29, %s2410_s29, %s2411_s14  }
  0x35   : > { %p2247_p6 = pnand %p2246_p4, %p2240_p2 }
  0x37   : > { %2250 = shalt.err (!%p2247_p6)
}
  0x38   : > { %s3206_s2 = sld [smem:[#allocation41_spill]]  ;;  %s2412_s22 = smov [#allocation13]  }
  0x39   : > { %s309_s26 = sshll.u32 %s2412_s22, 4  ;;  %s310_s26 = int_to_ptr.vmem [resolvable:$true] %s309_s26 }
  0x3a   : > { %s2262_s27 = scalar_lea.vmem %s310_s26, 2048  ;;  %p2270_p0 = scmp.lt.s32.totalorder %s310_s26, %s310_s26 }
  0x3b   : > { %p2263_p9 = scmp.ne.s32.totalorder %s310_s26, %s2262_s27  ;;  %p2271_p3 = scmp.lt.s32.totalorder %s2262_s27, %s2262_s27 }
  0x3d   : > { %p2265_p7 = pnand %p2263_p9, %p2175_p13  ;;  %p2272_p8 = por %p2271_p3, %p2270_p0 }
  0x3e   : > { %2059 = dma.hbm_to_vmem [thread:$0]  (!%p2522_p12), %s3206_s2, 6144, %s278_s24, [#allocation9], %s2410_s29, %s2410_s29, %s2411_s14  }
  0x3f   : > { %p2266_p11 = pneg %p2265_p7 }
  0x41   : > { %p2273_p1 = pnand %p2272_p8, %p2266_p11 }
  0x43   : > { %2276 = shalt.err (!%p2273_p1)
}
  0x44   : > { %s3175_s28 = smov 128   ;;  %s3176_s24 = smov 8  }
  0x45   : > { %2065 = dma.hbm_to_vmem [thread:$0]  (!%p2522_p12), %s3168_s6, 2048, %s310_s26, [#allocation12], %s3175_s28, %s3175_s28, %s3176_s24  }
  0x46   : > { %s2564_s18 = sadd.s32 1, %s2405_s12   ;;  %s36_s19 = sadd.s32 1, %s2401_s11 }
  0x47   : > { %s33_s21 = ssub.s32 %s2405_s12, %s2564_s18  ;;  %p43_p2 = scmp.ne.s32.totalorder %s2401_s11, %s2397_s10 }
  0x48   : > { %p34_p13 = scmp.eq.s32.totalorder %s33_s21, 0  ;;  %p44_p10 = scmp.eq.s32.totalorder %s2405_s12, 0 }
  0x49   : > { %p3207_p4 = scmp.eq.s32.totalorder %s2493_s13, 1  ;;  %p2078_p9 = scmp.lt.s32.totalorder %s2405_s12, 2 }
  0x4a   : > { %s2573_s23 = scalar_select %p34_p13, %s2401_s11, %s36_s19  }
  0x4b   : > { %p45_p5 = por %p44_p10, %p43_p2  ;;  %p2577_p6 = por %p3207_p4, %p43_p2 }
  0x4c   : > { %s326_s25 = sand.u32 1, %s2401_s11   ;;  %s1703_s26 = sshll.u32 %s2405_s12, 9 }
  0x4d   : > { %s3208_s20 = scalar_select %p2577_p6, 1, 0 }
  0x4e   : > { %s1675_s22 = sshll.u32 %s326_s25, 5  ;;  %s2587_s14 = scalar_lea.hbm %s3162_s0, %s1703_s26 }
  0x4f   : > { %s330_s21 = scalar_lea.vmem [#allocation5], %s1675_s22  ;;  %p2591_p12 = pnand %p2078_p9, %p45_p5 }
  0x50   : > { %s337_s19 = sshll.u32 %s330_s21, 4  ;;  %s2595_s24 = scalar_lea.sflag [#allocation6], %s326_s25  ;;  %s2589_s19 = int_to_ptr.vmem [resolvable:$true] %s337_s19 }
  0x51   : > { %s2277_s1 = scalar_lea.hbm %s2587_s14, 512  ;;  %p2279_p11 = pneg %p2591_p12 }
  0x52   : > { %p2278_p7 = scmp.ne.s32.totalorder %s2587_s14, %s2277_s1  ;;  %s2282_s22 = scalar_lea.hbm %s3162_s0, 1024 }
  0x53   : > { %p2283_p8 = scmp.lt.s32.totalorder %s2587_s14, %s3162_s0  ;;  %p2284_p1 = scmp.lt.s32.totalorder %s2282_s22, %s2277_s1 }
  0x54   : > { %p2280_p0 = pnand %p2279_p11, %p2278_p7 }
  0x55   : > { %p2285_p13 = por %p2284_p1, %p2283_p8 }
  0x56   : > { %p2281_p3 = pneg %p2280_p0 }
  0x58   : > { %p2286_p2 = pnand %p2285_p13, %p2281_p3 }
  0x5a   : > { %2289 = shalt.err (!%p2286_p2)
}
  0x5b   : > { %s2290_s25 = scalar_lea.vmem %s2589_s19, 512  ;;  %s2415_s2 = smov [#allocation5]  }
  0x5c   : > { %p2291_p10 = scmp.ne.s32.totalorder %s2589_s19, %s2290_s25  ;;  %s2295_s3 = sshll.u32 %s2415_s2, 4  ;;  %s2296_s3 = int_to_ptr.vmem [resolvable:$false] %s2295_s3 }
  0x5d   : > { %s2297_s26 = scalar_lea.vmem %s2296_s3, 1024  ;;  %p2298_p9 = scmp.lt.s32.totalorder %s2589_s19, %s2296_s3 }
  0x5e   : > { %p2293_p5 = pnand %p2291_p10, %p2279_p11  ;;  %p2299_p7 = scmp.lt.s32.totalorder %s2297_s26, %s2290_s25 }
  0x60   : > { %p2294_p4 = pneg %p2293_p5  ;;  %p2300_p0 = por %p2299_p7, %p2298_p9 }
  0x62   : > { %p2301_p6 = pnand %p2300_p0, %p2294_p4 }
  0x64   : > { %2304 = shalt.err (!%p2301_p6)
}
  0x65   : > { %s3210_s1 = smov 8   ;;  %s3211_s27 = smov 128  }
  0x66   : > { %2069 = dma.hbm_to_vmem [thread:$0]  (!%p2591_p12), %s2587_s14, 512, %s2589_s19, %s2595_s24, %s3211_s27, %s3211_s27, %s3210_s1  }
  0x67   : > { %p3212_p11 = scmp.ne.s32.totalorder %s3202_s17, 0 }
  0x69   : > { %349 = sbr.rel (%p3212_p11) target bundleno = 1409 (0x581), region = 52 }
  0x6e   : > { %s2622_s2 = sand.u32 1, %s2397_s10   ;;  %p3213_p6 = scmp.ne.s32.totalorder %s3200_s15, 0 }
  0x6f   : > { %s1679_s3 = sshll.u32 %s2622_s2, 5  ;;  %s352_s22 = scalar_lea.sflag [#allocation6], %s2622_s2 }
  0x70   : > { %s2626_s29 = scalar_lea.vmem [#allocation5], %s1679_s3 }
  0x71   : > { %2372 = dma.done.wait (%p3213_p6), %s352_s22, 512  }
  0x72   : > { %2374 = vsyncadd (%p3213_p6), %s352_s22, 4294966784  ;;  %p3214_p12 = scmp.eq.s32.totalorder %s2493_s13, 0 }
  0x74   : > { %2376 = dma.done.wait (%p3214_p12), [#allocation9], 6272   ;;  %p3215_p3 = pmov %p3214_p12 }
  0x76   : > { %2378 = vsyncadd (%p3215_p3), [#allocation9], 4294961024  ;;  %p3216_p8 = pmov %p3215_p3 }
  0x77   : > { %p3217_p1 = pmov %p3215_p3 }
  0x78   : > { %2380 = dma.done.wait (%p3216_p8), [#allocation12], 8192  }
  0x79   : > { %2382 = vsyncadd (%p3217_p1), [#allocation12], 4294959104  ;;  %s2640_s17 = scalar_lea.vmem [#allocation14], %s1679_s3  ;;  %p3218_p13 = scmp.ne.s32.totalorder %s2493_s13, 0 }
  0x7b   : > { %411 = sbr.rel (%p3218_p13) target bundleno = 130 (0x82), region = 76 }
  0x80   : > { %v412_v0 = vld [vmem:[#allocation8] sm:$0xff] }
  0x81   : > { %413 = vst [vmem:[#allocation2] sm:$0xff] %v412_v0 }
  0x82 PF: > { %v464_v1 = vld [vmem:[#allocation10 + $0x170] sm:$0xff]  ;;  %v463_v2 = vld [vmem:[#allocation10 + $0x168] sm:$0xff]  ;;  %v461_v3 = vld [vmem:[#allocation10 + $0x158] sm:$0xff]  ;;  %v3180_v7 = vmov 0.0   ;;  %vm2417_vm0 = vmmov 0   ;;  %s2418_s25 = smov [#allocation15]  }
  0x83   : > { %483 = vmatprep.subr.mxu1 %v464_v1  ;;  %v2644_v4 = vld [vmem:[#allocation11 + $0x170] sm:$0xff]  ;;  %v2646_v6 = vld [vmem:[#allocation11 + $0x168] sm:$0xff]  ;;  %547 = vmatprep.mubr.f32.mxu1 %v3180_v7  ;;  %v458_v8 = vld [vmem:[#allocation10 + $0x140] sm:$0xff]  ;;  %s1549_s26 = sshll.u32 %s2418_s25, 4  ;;  %p3259_p10 = scmp.eq.s32.totalorder %s2493_s13, 1  ;;  %s1550_s26 = int_to_ptr.vmem [resolvable:$true] %s1549_s26 }
  0x84   : > { %3219 = vst [vmem:[#allocation22_spill] sm:$0xff] %v2644_v4  ;;  %v460_v5 = vld [vmem:[#allocation10 + $0x150] sm:$0xff]  ;;  %484 = vmatpush1.msra.mxu1 %v463_v2  ;;  %728 = vmatprep.subr.mxu0 %v2644_v4  ;;  %v2650_v9 = vld [vmem:[#allocation11 + $0x158] sm:$0xff]  ;;  %v2655_v12 = vld [vmem:[#allocation11 + $0x140] sm:$0xff]  ;;  %s2305_s1 = scalar_lea.vmem %s1550_s26, 128  ;;  %p2312_p9 = scmp.lt.s32.totalorder %s1550_s26, %s1550_s26 }
  0x85   : > { %485 = vmatprep.subr.mxu1 %v461_v3  ;;  %729 = vmatpush1.msra.mxu0 %v2646_v6  ;;  %v457_v10 = vld [vmem:[#allocation10 + $0x138] sm:$0xff]  ;;  %v2653_v11 = vld [vmem:[#allocation11 + $0x150] sm:$0xff]  ;;  %v455_v13 = vld [vmem:[#allocation10 + $0x128] sm:$0xff]  ;;  %p2306_p2 = scmp.ne.s32.totalorder %s1550_s26, %s2305_s1  ;;  %p2313_p7 = scmp.lt.s32.totalorder %s2305_s1, %s2305_s1 }
  0x86   : > { %486 = vmatpush1.msra.mxu1 %v460_v5  ;;  %730 = vmatprep.subr.mxu0 %v2650_v9  ;;  %v2658_v14 = vld [vmem:[#allocation11 + $0x138] sm:$0xff]  ;;  %v454_v15 = vld [vmem:[#allocation10 + $0x120] sm:$0xff]  ;;  %v2661_v16 = vld [vmem:[#allocation11 + $0x128] sm:$0xff] }
  0x87   : > { %487 = vmatprep.subr.mxu1 %v458_v8  ;;  %731 = vmatpush1.msra.mxu0 %v2653_v11  ;;  %v452_v17 = vld [vmem:[#allocation10 + $0x110] sm:$0xff]  ;;  %v2664_v18 = vld [vmem:[#allocation11 + $0x120] sm:$0xff]  ;;  %v451_v19 = vld [vmem:[#allocation10 + $0x108] sm:$0xff]  ;;  %p2307_p5 = pnand %p2306_p2, %p3259_p10  ;;  %p2314_p0 = por %p2313_p7, %p2312_p9 }
  0x88   : > { %488 = vmatpush1.msra.mxu1 %v457_v10  ;;  %732 = vmatprep.subr.mxu0 %v2655_v12  ;;  %v2667_v20 = vld [vmem:[#allocation11 + $0x110] sm:$0xff]  ;;  %v449_v21 = vld [vmem:[#allocation10 + $0xf8] sm:$0xff]  ;;  %v2670_v22 = vld [vmem:[#allocation11 + $0x108] sm:$0xff] }
  0x89   : > { %489 = vmatprep.subr.mxu1 %v455_v13  ;;  %733 = vmatpush1.msra.mxu0 %v2658_v14  ;;  %v448_v23 = vld [vmem:[#allocation10 + $0xf0] sm:$0xff]  ;;  %v2673_v24 = vld [vmem:[#allocation11 + $0xf8] sm:$0xff]  ;;  %v446_v25 = vld [vmem:[#allocation10 + $0xe0] sm:$0xff]  ;;  %p2308_p4 = pneg %p2307_p5 }
  0x8a   : > { %490 = vmatpush1.msra.mxu1 %v454_v15  ;;  %734 = vmatprep.subr.mxu0 %v2661_v16  ;;  %v2676_v26 = vld [vmem:[#allocation11 + $0xf0] sm:$0xff]  ;;  %v445_v27 = vld [vmem:[#allocation10 + $0xd8] sm:$0xff]  ;;  %v2679_v28 = vld [vmem:[#allocation11 + $0xe0] sm:$0xff] }
  0x8b   : > { %491 = vmatprep.subr.mxu1 %v452_v17  ;;  %735 = vmatpush1.msra.mxu0 %v2664_v18  ;;  %v443_v29 = vld [vmem:[#allocation10 + $0xc8] sm:$0xff]  ;;  %v2682_v30 = vld [vmem:[#allocation11 + $0xd8] sm:$0xff]  ;;  %v442_v31 = vld [vmem:[#allocation10 + $0xc0] sm:$0xff]  ;;  %p2315_p11 = pnand %p2314_p0, %p2308_p4 }
  0x8c   : > { %492 = vmatpush1.msra.mxu1 %v451_v19  ;;  %736 = vmatprep.subr.mxu0 %v2667_v20  ;;  %v2685_v32 = vld [vmem:[#allocation11 + $0xc8] sm:$0xff]  ;;  %v440_v33 = vld [vmem:[#allocation10 + $0xb0] sm:$0xff]  ;;  %v2688_v34 = vld [vmem:[#allocation11 + $0xc0] sm:$0xff] }
  0x8d   : > { %493 = vmatprep.subr.mxu1 %v449_v21  ;;  %737 = vmatpush1.msra.mxu0 %v2670_v22  ;;  %v439_v35 = vld [vmem:[#allocation10 + $0xa8] sm:$0xff]  ;;  %v2691_v36 = vld [vmem:[#allocation11 + $0xb0] sm:$0xff]  ;;  %v437_v37 = vld [vmem:[#allocation10 + $0x98] sm:$0xff] }
  0x8e   : > { %494 = vmatpush1.msra.mxu1 %v448_v23  ;;  %738 = vmatprep.subr.mxu0 %v2673_v24  ;;  %v2694_v38 = vld [vmem:[#allocation11 + $0xa8] sm:$0xff]  ;;  %v436_v39 = vld [vmem:[#allocation10 + $0x90] sm:$0xff]  ;;  %v2697_v40 = vld [vmem:[#allocation11 + $0x98] sm:$0xff] }
  0x8f   : > { %495 = vmatprep.subr.mxu1 %v446_v25  ;;  %739 = vmatpush1.msra.mxu0 %v2676_v26  ;;  %v434_v41 = vld [vmem:[#allocation10 + $0x80] sm:$0xff]  ;;  %v2700_v42 = vld [vmem:[#allocation11 + $0x90] sm:$0xff]  ;;  %v433_v43 = vld [vmem:[#allocation10 + $0x78] sm:$0xff] }
  0x90   : > { %496 = vmatpush1.msra.mxu1 %v445_v27  ;;  %740 = vmatprep.subr.mxu0 %v2679_v28  ;;  %v2703_v44 = vld [vmem:[#allocation11 + $0x80] sm:$0xff]  ;;  %v431_v45 = vld [vmem:[#allocation10 + $0x68] sm:$0xff]  ;;  %v2706_v46 = vld [vmem:[#allocation11 + $0x78] sm:$0xff] }
  0x91   : > { %497 = vmatprep.subr.mxu1 %v443_v29  ;;  %741 = vmatpush1.msra.mxu0 %v2682_v30  ;;  %v430_v47 = vld [vmem:[#allocation10 + $0x60] sm:$0xff]  ;;  %v2709_v48 = vld [vmem:[#allocation11 + $0x68] sm:$0xff]  ;;  %v428_v49 = vld [vmem:[#allocation10 + $0x50] sm:$0xff] }
  0x92   : > { %498 = vmatpush1.msra.mxu1 %v442_v31  ;;  %742 = vmatprep.subr.mxu0 %v2685_v32  ;;  %v2712_v50 = vld [vmem:[#allocation11 + $0x60] sm:$0xff]  ;;  %v427_v51 = vld [vmem:[#allocation10 + $0x48] sm:$0xff]  ;;  %v2715_v52 = vld [vmem:[#allocation11 + $0x50] sm:$0xff] }
  0x93   : > { %499 = vmatprep.subr.mxu1 %v440_v33  ;;  %743 = vmatpush1.msra.mxu0 %v2688_v34  ;;  %v425_v53 = vld [vmem:[#allocation10 + $0x38] sm:$0xff]  ;;  %v2718_v54 = vld [vmem:[#allocation11 + $0x48] sm:$0xff]  ;;  %v424_v55 = vld [vmem:[#allocation10 + $0x30] sm:$0xff] }
  0x94   : > { %500 = vmatpush1.msra.mxu1 %v439_v35  ;;  %744 = vmatprep.subr.mxu0 %v2691_v36  ;;  %v2721_v56 = vld [vmem:[#allocation11 + $0x38] sm:$0xff]  ;;  %v422_v57 = vld [vmem:[#allocation10 + $0x20] sm:$0xff]  ;;  %v2724_v58 = vld [vmem:[#allocation11 + $0x30] sm:$0xff] }
  0x95   : > { %501 = vmatprep.subr.mxu1 %v437_v37  ;;  %745 = vmatpush1.msra.mxu0 %v2694_v38  ;;  %v421_v59 = vld [vmem:[#allocation10 + $0x18] sm:$0xff]  ;;  %v2727_v60 = vld [vmem:[#allocation11 + $0x20] sm:$0xff]  ;;  %v419_v61 = vld [vmem:[#allocation10 + $0x8] sm:$0xff] }
  0x96   : > { %502 = vmatpush1.msra.mxu1 %v436_v39  ;;  %746 = vmatprep.subr.mxu0 %v2697_v40  ;;  %3220 = vst [vmem:[#allocation23_spill] sm:$0xff] %v2727_v60  ;;  %v2730_v62 = vld [vmem:[#allocation11 + $0x18] sm:$0xff]  ;;  %v418_v63 = vld [vmem:[#allocation10] sm:$0xff]  ;;  %v2733_v0 = vld [vmem:[#allocation11 + $0x8] sm:$0xff] }
  0x97   : > { %503 = vmatprep.subr.mxu1 %v434_v41  ;;  %747 = vmatpush1.msra.mxu0 %v2700_v42  ;;  %3221 = vst [vmem:[#allocation24_spill] sm:$0xff] %v2730_v62  ;;  %3222 = vst [vmem:[#allocation25_spill] sm:$0xff] %v2733_v0  ;;  %v414_v1 = vld [vmem:[%s2626_s29] sm:$0xff]  ;;  %v2738_v3 = vld [vmem:[#allocation11] sm:$0xff] }
  0x98   : > { %504 = vmatpush1.msra.mxu1 %v433_v43  ;;  %748 = vmatprep.subr.mxu0 %v2703_v44  ;;  %v465_v2 = vld [vmem:[#allocation10 + $0x178] sm:$0xff]  ;;  %3223 = vst [vmem:[#allocation26_spill] sm:$0xff] %v2738_v3  ;;  %v462_v5 = vld [vmem:[#allocation10 + $0x160] sm:$0xff]  ;;  %v2741_v8 = vld [vmem:[#allocation2] sm:$0xff] }
  0x99   : > { %505 = vmatprep.subr.mxu1 %v431_v45  ;;  %749 = vmatpush1.msra.mxu0 %v2706_v46  ;;  %v459_v10 = vld [vmem:[#allocation10 + $0x148] sm:$0xff]  ;;  %v456_v13 = vld [vmem:[#allocation10 + $0x130] sm:$0xff]  ;;  %v2747_v15 = vld [vmem:[%s2626_s29 + $0x8] sm:$0xff] }
  0x9a   : > { %506 = vmatpush1.msra.mxu1 %v430_v47  ;;  %750 = vmatprep.subr.mxu0 %v2709_v48  ;;  %3224 = vst [vmem:[#allocation27_spill] sm:$0xff] %v2747_v15  ;;  %v453_v17 = vld [vmem:[#allocation10 + $0x118] sm:$0xff]  ;;  %v450_v19 = vld [vmem:[#allocation10 + $0x100] sm:$0xff]  ;;  %v2754_v21 = vld [vmem:[%s2626_s29 + $0x10] sm:$0xff] }
  0x9b   : > { %507 = vmatprep.subr.mxu1 %v428_v49  ;;  %751 = vmatpush1.msra.mxu0 %v2712_v50  ;;  %v447_v23 = vld [vmem:[#allocation10 + $0xe8] sm:$0xff]  ;;  %v444_v25 = vld [vmem:[#allocation10 + $0xd0] sm:$0xff]  ;;  %v441_v29 = vld [vmem:[#allocation10 + $0xb8] sm:$0xff] }
  0x9c   : > { %508 = vmatpush1.msra.mxu1 %v427_v51  ;;  %752 = vmatprep.subr.mxu0 %v2715_v52  ;;  %v2761_v27 = vld [vmem:[%s2626_s29 + $0x18] sm:$0xff]  ;;  %v438_v31 = vld [vmem:[#allocation10 + $0xa0] sm:$0xff]  ;;  %v435_v33 = vld [vmem:[#allocation10 + $0x88] sm:$0xff] }
  0x9d   : > { %509 = vmatprep.subr.mxu1 %v425_v53  ;;  %753 = vmatpush1.msra.mxu0 %v2718_v54  ;;  %3225 = vst [vmem:[#allocation28_spill] sm:$0xff] %v2761_v27  ;;  %v432_v35 = vld [vmem:[#allocation10 + $0x70] sm:$0xff]  ;;  %v429_v37 = vld [vmem:[#allocation10 + $0x58] sm:$0xff]  ;;  %v426_v39 = vld [vmem:[#allocation10 + $0x40] sm:$0xff] }
  0x9e   : > { %510 = vmatpush1.msra.mxu1 %v424_v55  ;;  %754 = vmatprep.subr.mxu0 %v2721_v56  ;;  %v423_v41 = vld [vmem:[#allocation10 + $0x28] sm:$0xff]  ;;  %v420_v43 = vld [vmem:[#allocation10 + $0x10] sm:$0xff]  ;;  %v2780_v45 = vld [vmem:[#allocation11 + $0x178] sm:$0xff] }
  0x9f   : > { %511 = vmatprep.subr.mxu1 %v422_v57  ;;  %755 = vmatpush1.msra.mxu0 %v2724_v58  ;;  %v2786_v47 = vld [vmem:[#allocation11 + $0x160] sm:$0xff]  ;;  %v2791_v49 = vld [vmem:[#allocation11 + $0x148] sm:$0xff]  ;;  %v2797_v51 = vld [vmem:[#allocation11 + $0x130] sm:$0xff] }
  0xa0   : > { %512 = vmatpush1.msra.mxu1 %v421_v59  ;;  %756 = vmatprep.subr.mxu0 %v2727_v60  ;;  %v2804_v53 = vld [vmem:[#allocation11 + $0x118] sm:$0xff]  ;;  %v2810_v55 = vld [vmem:[#allocation11 + $0x100] sm:$0xff]  ;;  %v2816_v57 = vld [vmem:[#allocation11 + $0xe8] sm:$0xff] }
  0xa1   : > { %513 = vmatprep.subr.mxu1 %v419_v61  ;;  %757 = vmatpush1.msra.mxu0 %v2730_v62  ;;  %v2822_v59 = vld [vmem:[#allocation11 + $0xd0] sm:$0xff]  ;;  %v2828_v61 = vld [vmem:[#allocation11 + $0xb8] sm:$0xff] }
  0xa2   : > { %514 = vmatpush1.msra.mxu1 %v418_v63  ;;  %758 = vmatprep.subr.mxu0 %v2733_v0  ;;  %v2834_v63 = vld [vmem:[#allocation11 + $0xa0] sm:$0xff] }
  0xa3   : > { %548 = vmatmul.mubr.f32.vlgmr.msra.gmra.mxu1 %v414_v1  ;;  %1813 = vmatprep.subr.mxu1 %v465_v2 }
  0xa4   : > { %1814 = vmatpush3.msra.mxu1 %v465_v2  ;;  %759 = vmatpush1.msra.mxu0 %v2738_v3  ;;  %v2843_v2 = vld [vmem:[#allocation11 + $0x70] sm:$0xff] }
  0xa5   : > { %792 = vmatprep.mubr.f32.mxu0 %v3180_v7  ;;  %1815 = vmatprep.subr.mxu1 %v462_v5 }
  0xa6   : > { %793 = vmatmul.mubr.f32.vlgmr.msra.gmra.mxu0 %v2741_v8  ;;  %1816 = vmatpush3.msra.mxu1 %v462_v5  ;;  %v2847_v5 = vld [vmem:[#allocation11 + $0x58] sm:$0xff] }
  0xa7   : > { %1817 = vmatprep.subr.mxu1 %v459_v10  ;;  %553 = vmatprep.mubr.f32.mxu1 %v3180_v7 }
  0xa8   : > { %1818 = vmatpush3.msra.mxu1 %v459_v10  ;;  %896 = vmatprep.subr.mxu0 %v2644_v4  ;;  %v2851_v10 = vld [vmem:[#allocation11 + $0x40] sm:$0xff] }
  0xa9   : > { %1819 = vmatprep.subr.mxu1 %v456_v13  ;;  %554 = vmatmul.mubr.f32.gmra.mxu1 %v2747_v15  ;;  %3226 = vst [vmem:[#allocation29_spill] sm:$0xff] %v2851_v10 }
  0xaa   : > { %1820 = vmatpush3.msra.mxu1 %v456_v13  ;;  %559 = vmatprep.mubr.f32.mxu1 %v3180_v7  ;;  %v2855_v13 = vld [vmem:[#allocation11 + $0x28] sm:$0xff] }
  0xab   : > { %1821 = vmatprep.subr.mxu1 %v453_v17  ;;  %897 = vmatpush1.msra.mxu0 %v2646_v6  ;;  %3227 = vst [vmem:[#allocation30_spill] sm:$0xff] %v2855_v13 }
  0xac   : > { %1822 = vmatpush3.msra.mxu1 %v453_v17  ;;  %898 = vmatprep.subr.mxu0 %v2650_v9  ;;  %v2859_v17 = vld [vmem:[#allocation11 + $0x10] sm:$0xff] }
  0xad   : > { %1823 = vmatprep.subr.mxu1 %v450_v19  ;;  %560 = vmatmul.mubr.f32.gmra.mxu1 %v2754_v21  ;;  %3228 = vst [vmem:[#allocation31_spill] sm:$0xff] %v2859_v17 }
  0xae   : > { %1824 = vmatpush3.msra.mxu1 %v450_v19  ;;  %565 = vmatprep.mubr.f32.mxu1 %v3180_v7  ;;  %v468_v19 = vlaneseq }
  0xaf   : > { %1825 = vmatprep.subr.mxu1 %v447_v23  ;;  %899 = vmatpush1.msra.mxu0 %v2653_v11 }
  0xb0   : > { %1826 = vmatpush3.msra.mxu1 %v447_v23  ;;  %900 = vmatprep.subr.mxu0 %v2655_v12 }
  0xb1   : > { %1827 = vmatprep.subr.mxu1 %v444_v25  ;;  %566 = vmatmul.mubr.f32.gmra.mxu1 %v2761_v27 }
  0xb2   : > { %1828 = vmatpush3.msra.mxu1 %v444_v25  ;;  %1845 = vmatprep.mubr.f32.mxu1 %v414_v1  ;;  %v2839_v1 = vld [vmem:[#allocation11 + $0x88] sm:$0xff] }
  0xb3   : > { %1829 = vmatprep.subr.mxu1 %v441_v29  ;;  %901 = vmatpush1.msra.mxu0 %v2658_v14 }
  0xb4   : > { %1830 = vmatpush3.msra.mxu1 %v441_v29  ;;  %902 = vmatprep.subr.mxu0 %v2661_v16  ;;  %v466_v29 = vld [vmem:[%s3166_s4] sm:$0x7] }
  0xb5   : > { %1831 = vmatprep.subr.mxu1 %v438_v31  ;;  %903 = vmatpush1.msra.mxu0 %v2664_v18 }
  0xb6   : > { %1832 = vmatpush3.msra.mxu1 %v438_v31  ;;  %904 = vmatprep.subr.mxu0 %v2667_v20 }
  0xb7   : > { %1833 = vmatprep.subr.mxu1 %v435_v33  ;;  %905 = vmatpush1.msra.mxu0 %v2670_v22 }
  0xb8   : > { %1834 = vmatpush3.msra.mxu1 %v435_v33  ;;  %906 = vmatprep.subr.mxu0 %v2673_v24 }
  0xb9   : > { %1835 = vmatprep.subr.mxu1 %v432_v35  ;;  %907 = vmatpush1.msra.mxu0 %v2676_v26 }
  0xba   : > { %1836 = vmatpush3.msra.mxu1 %v432_v35  ;;  %908 = vmatprep.subr.mxu0 %v2679_v28 }
  0xbb   : > { %1837 = vmatprep.subr.mxu1 %v429_v37  ;;  %909 = vmatpush1.msra.mxu0 %v2682_v30 }
  0xbc   : > { %1838 = vmatpush3.msra.mxu1 %v429_v37  ;;  %910 = vmatprep.subr.mxu0 %v2685_v32 }
  0xbd   : > { %1839 = vmatprep.subr.mxu1 %v426_v39  ;;  %911 = vmatpush1.msra.mxu0 %v2688_v34 }
  0xbe   : > { %1840 = vmatpush3.msra.mxu1 %v426_v39  ;;  %912 = vmatprep.subr.mxu0 %v2691_v36 }
  0xbf   : > { %1841 = vmatprep.subr.mxu1 %v423_v41  ;;  %913 = vmatpush1.msra.mxu0 %v2694_v38 }
  0xc0   : > { %1842 = vmatpush3.msra.mxu1 %v423_v41  ;;  %914 = vmatprep.subr.mxu0 %v2697_v40 }
  0xc1   : > { %1843 = vmatprep.subr.mxu1 %v420_v43  ;;  %915 = vmatpush1.msra.mxu0 %v2700_v42 }
  0xc2   : > { %1844 = vmatpush3.msra.mxu1 %v420_v43  ;;  %916 = vmatprep.subr.mxu0 %v2703_v44 }
  0xc3   : > { %1846 = vmatmul.mubr.f32.vlgmr.msra.gmra.mxu1 %v2747_v15  ;;  %1851 = vmatprep.subr.mxu1 %v3180_v7 }
  0xc4   : > { %1852 = vmatpush3.msra.mxu1 %v2780_v45  ;;  %1848 = vmatprep.mubr.f32.mxu1 %v2754_v21  ;;  %v469_v21 = vshrl.u32 %v468_v19, 7 }
  0xc5   : > { %1853 = vmatprep.subr.mxu1 %v3180_v7  ;;  %917 = vmatpush1.msra.mxu0 %v2706_v46 }
  0xc6   : > { %1854 = vmatpush3.msra.mxu1 %v2786_v47  ;;  %918 = vmatprep.subr.mxu0 %v2709_v48  ;;  %v470_v25 = vsub.s32 0, %v469_v21  ;;  %v474_v31 = vsub.s32 1, %v469_v21 }
  0xc7   : > { %1855 = vmatprep.subr.mxu1 %v3180_v7  ;;  %1849 = vmatmul.mubr.f32.gmra.mxu1 %v2761_v27 }
  0xc8   : > { %1856 = vmatpush3.msra.mxu1 %v2791_v49  ;;  %1883 = vmatprep.mubr.msk.f32.mxu1 %vm2417_vm0, %v3180_v7  ;;  %v471_v35 = vrot.slane %v466_v29, %v470_v25  ;;  %v475_v39 = vrot.slane %v466_v29, %v474_v31 }
  0xc9   : > { %1857 = vmatprep.subr.mxu1 %v3180_v7  ;;  %919 = vmatpush1.msra.mxu0 %v2712_v50 }
  0xca   : > { %1858 = vmatpush3.msra.mxu1 %v2797_v51  ;;  %920 = vmatprep.subr.mxu0 %v2715_v52 }
  0xcb   : > { %1859 = vmatprep.subr.mxu1 %v3180_v7  ;;  %921 = vmatpush1.msra.mxu0 %v2718_v54 }
  0xcc   : > { %1860 = vmatpush3.msra.mxu1 %v2804_v53  ;;  %922 = vmatprep.subr.mxu0 %v2721_v56 }
  0xcd   : > { %1861 = vmatprep.subr.mxu1 %v3180_v7  ;;  %923 = vmatpush1.msra.mxu0 %v2724_v58 }
  0xce   : > { %1862 = vmatpush3.msra.mxu1 %v2810_v55  ;;  %924 = vmatprep.subr.mxu0 %v2727_v60 }
  0xcf   : > { %1863 = vmatprep.subr.mxu1 %v3180_v7  ;;  %925 = vmatpush1.msra.mxu0 %v2730_v62 }
  0xd0   : > { %1864 = vmatpush3.msra.mxu1 %v2816_v57  ;;  %926 = vmatprep.subr.mxu0 %v2733_v0 }
  0xd1   : > { %1865 = vmatprep.subr.mxu1 %v3180_v7  ;;  %927 = vmatpush1.msra.mxu0 %v2738_v3 }
  0xd2   : > { %1866 = vmatpush3.msra.mxu1 %v2822_v59  ;;  %960 = vmatprep.mubr.f32.mxu0 %v3180_v7 }
  0xd3   : > { %1867 = vmatprep.subr.mxu1 %v3180_v7  ;;  %1065 = vmatprep.subr.mxu0 %v2644_v4 }
  0xd4   : > { %1868 = vmatpush3.msra.mxu1 %v2828_v61 }
  0xd5   : > { %1869 = vmatprep.subr.mxu1 %v3180_v7 }
  0xd6   : > { %1870 = vmatpush3.msra.mxu1 %v2834_v63 }
  0xd7   : > { %1871 = vmatprep.subr.mxu1 %v3180_v7 }
  0xd8   : > { %1872 = vmatpush3.msra.mxu1 %v2839_v1 }
  0xd9   : > { %1873 = vmatprep.subr.mxu1 %v3180_v7 }
  0xda   : > { %1874 = vmatpush3.msra.mxu1 %v2843_v2 }
  0xdb   : > { %1875 = vmatprep.subr.mxu1 %v3180_v7 }
  0xdc   : > { %1876 = vmatpush3.msra.mxu1 %v2847_v5 }
  0xdd   : > { %1877 = vmatprep.subr.mxu1 %v3180_v7 }
  0xde   : > { %1878 = vmatpush3.msra.mxu1 %v2851_v10 }
  0xdf   : > { %1879 = vmatprep.subr.mxu1 %v3180_v7 }
  0xe0   : > { %1880 = vmatpush3.msra.mxu1 %v2855_v13 }
  0xe1   : > { %1881 = vmatprep.subr.mxu1 %v3180_v7 }
  0xe2   : > { %1882 = vmatpush3.msra.mxu1 %v2859_v17 }
  0xe3   : > { %1884 = vmatmul.mubr.f32.vlgmr.msra.gmra.mxu1 %v2741_v8  ;;  %1886 = vmatprep.subr.mxu1 %v3180_v7 }
  0xe4   : > { %1887 = vmatpush3.msra.mxu1 %v2780_v45  ;;  %1918 = vmatprep.mubr.msk.f32.mxu1 %vm2417_vm0, %v3180_v7 }
  0xe5   : > { %1888 = vmatprep.subr.mxu1 %v3180_v7 }
  0xe6   : > { %1889 = vmatpush3.msra.mxu1 %v2786_v47 }
  0xe7   : > { %1890 = vmatprep.subr.mxu1 %v3180_v7 }
  0xe8   : > { %1891 = vmatpush3.msra.mxu1 %v2791_v49 }
  0xe9   : > { %1892 = vmatprep.subr.mxu1 %v3180_v7 }
  0xea   : > { %1893 = vmatpush3.msra.mxu1 %v2797_v51 }
  0xeb   : > { %1894 = vmatprep.subr.mxu1 %v3180_v7 }
  0xec   : > { %1895 = vmatpush3.msra.mxu1 %v2804_v53 }
  0xed   : > { %1896 = vmatprep.subr.mxu1 %v3180_v7 }
  0xee   : > { %1897 = vmatpush3.msra.mxu1 %v2810_v55 }
  0xef   : > { %1898 = vmatprep.subr.mxu1 %v3180_v7 }
  0xf0   : > { %1899 = vmatpush3.msra.mxu1 %v2816_v57 }
  0xf1   : > { %1900 = vmatprep.subr.mxu1 %v3180_v7 }
  0xf2   : > { %1901 = vmatpush3.msra.mxu1 %v2822_v59 }
  0xf3   : > { %1902 = vmatprep.subr.mxu1 %v3180_v7 }
  0xf4   : > { %1903 = vmatpush3.msra.mxu1 %v2828_v61 }
  0xf5   : > { %1904 = vmatprep.subr.mxu1 %v3180_v7 }
  0xf6   : > { %1905 = vmatpush3.msra.mxu1 %v2834_v63 }
  0xf7   : > { %1906 = vmatprep.subr.mxu1 %v3180_v7 }
  0xf8   : > { %1907 = vmatpush3.msra.mxu1 %v2839_v1 }
  0xf9   : > { %1908 = vmatprep.subr.mxu1 %v3180_v7 }
  0xfa   : > { %1909 = vmatpush3.msra.mxu1 %v2843_v2 }
  0xfb   : > { %1910 = vmatprep.subr.mxu1 %v3180_v7 }
  0xfc   : > { %1911 = vmatpush3.msra.mxu1 %v2847_v5 }
  0xfd   : > { %1912 = vmatprep.subr.mxu1 %v3180_v7 }
  0xfe   : > { %1913 = vmatpush3.msra.mxu1 %v2851_v10 }
  0xff   : > { %1914 = vmatprep.subr.mxu1 %v3180_v7 }
 0x100   : > { %1915 = vmatpush3.msra.mxu1 %v2855_v13 }
 0x101   : > { %1916 = vmatprep.subr.mxu1 %v3180_v7 }
 0x102   : > { %1917 = vmatpush3.msra.mxu1 %v2859_v17 }
 0x103   : > { %1921 = vmatprep.subr.mxu1 %v3180_v7 }
 0x163   : > { %v549_v23 = vpop.f32.mrf.mxu1 }
 0x164   : > { %v550_v25 = vadd.f32 %v549_v23, %v471_v35 }
 0x165   : > { %v551_v33 = vpop.f32.mrf.mxu1 }
 0x166   : > { %v794_v62 = vpop.f32.mrf.mxu0 }
 0x167   : > { %v869_v31 = vadd.f32 %v794_v62, %v550_v25 }
 0x169   : > { %v555_v37 = vpop.f32.mrf.mxu1 }
 0x16a   : > { %v2903_v41 = vadd.f32 %v555_v37, %v471_v35  ;;  %v478_v37 = vsub.s32 2, %v469_v21 }
 0x16b   : > { %v557_v43 = vpop.f32.mrf.mxu1 }
 0x16c   : > { %3229 = vst [vmem:[#allocation32_spill] sm:$0xff] %v2903_v41  ;;  %v2905_v27 = vadd.f32 %v557_v43, %v475_v39  ;;  %v1687_v41 = vmul.f32 -1.442695, %v869_v31  ;;  %v479_v60 = vrot.slane %v466_v29, %v478_v37  ;;  %v2924_v29 = vld [vmem:[%s3167_s5] ss:$0 sm:$0xff] }
 0x16d   : > { %v561_v15 = vpop.f32.mrf.mxu1 }
 0x16e   : > { %3230 = vst [vmem:[#allocation33_spill] sm:$0xff] %v2905_v27  ;;  %v2907_v7 = vadd.f32 %v561_v15, %v471_v35  ;;  %2131 = vpow2.f32 %v1687_v41 }
 0x16f   : > { %v563_v19 = vpop.f32.mrf.mxu1 }
 0x170   : > { %3231 = vst [vmem:[#allocation34_spill] sm:$0xff] %v2907_v7  ;;  %v2909_v4 = vadd.f32 %v563_v19, %v475_v39  ;;  %v552_v7 = vadd.f32 %v551_v33, %v475_v39  ;;  %v796_v19 = vpop.f32.mrf.mxu0 }
 0x171   : > { %v567_v17 = vpop.f32.mrf.mxu1 }
 0x172   : > { %3232 = vst [vmem:[#allocation35_spill] sm:$0xff] %v2909_v4  ;;  %v2911_v3 = vadd.f32 %v567_v17, %v471_v35 }
 0x173   : > { %v569_v0 = vpop.f32.mrf.mxu1 }
 0x174   : > { %3233 = vst [vmem:[#allocation36_spill] sm:$0xff] %v2911_v3  ;;  %v2913_v13 = vadd.f32 %v569_v0, %v475_v39  ;;  %v876_v3 = vadd.f32 %v796_v19, %v552_v7 }
 0x176   : > { %3234 = vst [vmem:[#allocation37_spill] sm:$0xff] %v2913_v13  ;;  %v1688_v23 = vmul.f32 -1.442695, %v876_v3 }
 0x178   : > { %2133 = vpow2.f32 %v1688_v23 }
 0x17b   : > { %v2132_v35 = vpop.eup %2131 }
 0x17c   : > { %v873_v62 = vadd.f32 1.0, %v2132_v35 }
 0x17e   : > { %2135 = vrcp.f32 %v873_v62  ;;  %v3240_v62 = vld [vmem:[#allocation24_spill] sm:$0xff] }
 0x183   : > { %v1847_v43 = vpop.f32.mrf.mxu1 }
 0x184   : > { %v2915_v27 = vadd.f32 %v1847_v43, %v479_v60 }
 0x185   : > { %v638_v15 = vpop.f32.mrf.mxu1  ;;  %v2134_v21 = vpop.eup %2133 }
 0x186   : > { %v880_v33 = vadd.f32 1.0, %v2134_v21  ;;  %v639_v7 = vadd.f32 %v638_v15, %v479_v60  ;;  %v3239_v15 = vld [vmem:[#allocation23_spill] sm:$0xff]  ;;  %v3241_v21 = vld [vmem:[#allocation30_spill] sm:$0xff] }
 0x187   : > { %v1850_v4 = vpop.f32.mrf.mxu1 }
 0x188   : > { %v2917_v10 = vadd.f32 %v1850_v4, %v479_v60  ;;  %2137 = vrcp.f32 %v880_v33  ;;  %v3242_v33 = vld [vmem:[#allocation25_spill] sm:$0xff] }
 0x189   : > { %v648_v17 = vpop.f32.mrf.mxu1 }
 0x18a   : > { %3235 = vst [vmem:[#allocation38_spill] sm:$0xff] %v2917_v10  ;;  %v2919_v0 = vadd.f32 %v648_v17, %v479_v60  ;;  %v3237_v60 = vmov 0.0  }
 0x18b   : > { %v2136_v41 = vpop.eup %2135 }
 0x18c   : > { %3236 = vst [vmem:[#allocation39_spill] sm:$0xff] %v2919_v0 }
 0x195   : > { %v2138_v37 = vpop.eup %2137 }
 0x196   : > { %v887_v43 = vsub.f32 1.0, %v2138_v37  ;;  %v889_v23 = vmul.f32 %v2138_v37, %v2741_v8  ;;  %v3238_v8 = vld [vmem:[#allocation29_spill] sm:$0xff] }
 0x1a3   : > { %v865_v39 = vpop.f32.mrf.mxu1 }
 0x1a4   : > { %v883_v4 = vadd.f32 %v2924_v29, %v865_v39  ;;  %v3243_v39 = vld [vmem:[#allocation26_spill] sm:$0xff] }
 0x1a5   : > { %v1885_v25 = vpop.f32.mrf.mxu1 }
 0x1a6   : > { %v884_v31 = vmul.f32 %v2136_v41, %v883_v4  ;;  %v3244_v4 = vld [vmem:[#allocation31_spill] sm:$0xff]  ;;  %v3245_v41 = vld [vmem:[#allocation22_spill] sm:$0xff] }
 0x1a8   : > { %v885_v3 = vadd.f32 %v884_v31, %v639_v7  ;;  %v3246_v31 = vld [vmem:[#allocation32_spill] sm:$0xff] }
 0x1aa   : > { %2139 = vtanh.f32 %v885_v3 }
 0x1b7   : > { %v2140_v19 = vpop.eup %2139 }
 0x1b8   : > { %v888_v17 = vmul.f32 %v2140_v19, %v887_v43 }
 0x1ba   : > { %v2928_v35 = vadd.f32 %v889_v23, %v888_v17  ;;  %v3247_v17 = vld [vmem:[#allocation33_spill] sm:$0xff] }
 0x1bc   : > { %961 = vmatmul.mubr.f32.vlgmr.msra.gmra.mxu0 %v2928_v35  ;;  %1919 = vmatmul.mubr.f32.vlgmr.msra.gmra.mxu1 %v2928_v35 }
 0x1bd   : > { %1066 = vmatpush1.msra.mxu0 %v2646_v6  ;;  %1922 = vmatpush3.msra.mxu1 %v2780_v45 }
 0x1be   : > { %1067 = vmatprep.subr.mxu0 %v2650_v9  ;;  %1923 = vmatprep.subr.mxu1 %v3237_v60 }
 0x1bf   : > { %1068 = vmatpush1.msra.mxu0 %v2653_v11  ;;  %1924 = vmatpush3.msra.mxu1 %v2786_v47 }
 0x1c0   : > { %1069 = vmatprep.subr.mxu0 %v2655_v12  ;;  %1925 = vmatprep.subr.mxu1 %v3237_v60 }
 0x1c1   : > { %1070 = vmatpush1.msra.mxu0 %v2658_v14  ;;  %1926 = vmatpush3.msra.mxu1 %v2791_v49 }
 0x1c2   : > { %1071 = vmatprep.subr.mxu0 %v2661_v16  ;;  %1927 = vmatprep.subr.mxu1 %v3237_v60 }
 0x1c3   : > { %1072 = vmatpush1.msra.mxu0 %v2664_v18  ;;  %1928 = vmatpush3.msra.mxu1 %v2797_v51 }
 0x1c4   : > { %1073 = vmatprep.subr.mxu0 %v2667_v20  ;;  %1929 = vmatprep.subr.mxu1 %v3237_v60 }
 0x1c5   : > { %1074 = vmatpush1.msra.mxu0 %v2670_v22  ;;  %1930 = vmatpush3.msra.mxu1 %v2804_v53 }
 0x1c6   : > { %1075 = vmatprep.subr.mxu0 %v2673_v24  ;;  %1931 = vmatprep.subr.mxu1 %v3237_v60 }
 0x1c7   : > { %1076 = vmatpush1.msra.mxu0 %v2676_v26  ;;  %1932 = vmatpush3.msra.mxu1 %v2810_v55 }
 0x1c8   : > { %1077 = vmatprep.subr.mxu0 %v2679_v28  ;;  %1933 = vmatprep.subr.mxu1 %v3237_v60 }
 0x1c9   : > { %1078 = vmatpush1.msra.mxu0 %v2682_v30  ;;  %1934 = vmatpush3.msra.mxu1 %v2816_v57 }
 0x1ca   : > { %1079 = vmatprep.subr.mxu0 %v2685_v32  ;;  %1935 = vmatprep.subr.mxu1 %v3237_v60 }
 0x1cb   : > { %1080 = vmatpush1.msra.mxu0 %v2688_v34  ;;  %1936 = vmatpush3.msra.mxu1 %v2822_v59 }
 0x1cc   : > { %1081 = vmatprep.subr.mxu0 %v2691_v36  ;;  %1937 = vmatprep.subr.mxu1 %v3237_v60 }
 0x1cd   : > { %1082 = vmatpush1.msra.mxu0 %v2694_v38  ;;  %1938 = vmatpush3.msra.mxu1 %v2828_v61 }
 0x1ce   : > { %1083 = vmatprep.subr.mxu0 %v2697_v40  ;;  %1939 = vmatprep.subr.mxu1 %v3237_v60 }
 0x1cf   : > { %1084 = vmatpush1.msra.mxu0 %v2700_v42  ;;  %1940 = vmatpush3.msra.mxu1 %v2834_v63 }
 0x1d0   : > { %1085 = vmatprep.subr.mxu0 %v2703_v44  ;;  %1941 = vmatprep.subr.mxu1 %v3237_v60 }
 0x1d1   : > { %1086 = vmatpush1.msra.mxu0 %v2706_v46  ;;  %1942 = vmatpush3.msra.mxu1 %v2839_v1 }
 0x1d2   : > { %1087 = vmatprep.subr.mxu0 %v2709_v48  ;;  %1943 = vmatprep.subr.mxu1 %v3237_v60 }
 0x1d3   : > { %1088 = vmatpush1.msra.mxu0 %v2712_v50  ;;  %1944 = vmatpush3.msra.mxu1 %v2843_v2 }
 0x1d4   : > { %1089 = vmatprep.subr.mxu0 %v2715_v52  ;;  %1945 = vmatprep.subr.mxu1 %v3237_v60 }
 0x1d5   : > { %1090 = vmatpush1.msra.mxu0 %v2718_v54  ;;  %1946 = vmatpush3.msra.mxu1 %v2847_v5 }
 0x1d6   : > { %1091 = vmatprep.subr.mxu0 %v2721_v56  ;;  %1947 = vmatprep.subr.mxu1 %v3237_v60 }
 0x1d7   : > { %1092 = vmatpush1.msra.mxu0 %v2724_v58  ;;  %1948 = vmatpush3.msra.mxu1 %v3238_v8 }
 0x1d8   : > { %1093 = vmatprep.subr.mxu0 %v3239_v15  ;;  %1949 = vmatprep.subr.mxu1 %v3237_v60 }
 0x1d9   : > { %1094 = vmatpush1.msra.mxu0 %v3240_v62  ;;  %1950 = vmatpush3.msra.mxu1 %v3241_v21 }
 0x1da   : > { %1095 = vmatprep.subr.mxu0 %v3242_v33  ;;  %1951 = vmatprep.subr.mxu1 %v3237_v60 }
 0x1db   : > { %1096 = vmatpush1.msra.mxu0 %v3243_v39  ;;  %1129 = vmatprep.mubr.f32.mxu0 %v3237_v60 }
 0x1dc   : > { %1952 = vmatpush3.msra.mxu1 %v3244_v4  ;;  %1953 = vmatprep.mubr.msk.f32.mxu1 %vm2417_vm0, %v3237_v60 }
 0x1dd   : > { %1234 = vmatprep.subr.mxu0 %v3245_v41  ;;  %1956 = vmatprep.subr.mxu1 %v3237_v60 }
 0x27c   : > { %v962_v25 = vpop.f32.mrf.mxu0  ;;  %v1033_v7 = vpop.f32.mrf.mxu1 }
 0x27d   : > { %v1037_v3 = vadd.f32 %v962_v25, %v3246_v31  ;;  %v1051_v41 = vadd.f32 %v2924_v29, %v1033_v7  ;;  %v3256_v7 = vld [vmem:[#allocation37_spill] sm:$0xff] }
 0x27e   : > { %v1920_v37 = vpop.f32.mrf.mxu1  ;;  %v964_v19 = vpop.f32.mrf.mxu0 }
 0x27f   : > { %v1689_v43 = vmul.f32 -1.442695, %v1037_v3  ;;  %v1044_v23 = vadd.f32 %v964_v19, %v3247_v17 }
 0x281   : > { %2141 = vpow2.f32 %v1689_v43  ;;  %v1690_v10 = vmul.f32 -1.442695, %v1044_v23 }
 0x283   : > { %2143 = vpow2.f32 %v1690_v10 }
 0x28e   : > { %v2142_v13 = vpop.eup %2141 }
 0x28f   : > { %v1041_v0 = vadd.f32 1.0, %v2142_v13  ;;  %v1408_v13 = vld [vmem:[#allocation13 + $0x18] sm:$0xff] }
 0x290   : > { %v2144_v4 = vpop.eup %2143 }
 0x291   : > { %2145 = vrcp.f32 %v1041_v0  ;;  %v1048_v39 = vadd.f32 1.0, %v2144_v4  ;;  %v1407_v0 = vld [vmem:[#allocation13 + $0x10] sm:$0xff] }
 0x293   : > { %2147 = vrcp.f32 %v1048_v39 }
 0x29e   : > { %v2146_v33 = vpop.eup %2145 }
 0x29f   : > { %v1052_v21 = vmul.f32 %v2146_v33, %v1051_v41 }
 0x2a0   : > { %v2148_v31 = vpop.eup %2147 }
 0x2a1   : > { %v1053_v25 = vadd.f32 %v1052_v21, %v2915_v27  ;;  %v1055_v3 = vsub.f32 1.0, %v2148_v31  ;;  %v1057_v19 = vmul.f32 %v2148_v31, %v2928_v35 }
 0x2a3   : > { %2149 = vtanh.f32 %v1053_v25 }
 0x2b0   : > { %v2150_v37 = vpop.eup %2149 }
 0x2b1   : > { %v1056_v43 = vmul.f32 %v2150_v37, %v1055_v3  ;;  %v1695_v3 = vld [vmem:[%s3169_s7] ss:$0 sm:$0xff] }
 0x2b3   : > { %v3004_v10 = vadd.f32 %v1057_v19, %v1056_v43 }
 0x2b5   : > { %1130 = vmatmul.mubr.f32.vlgmr.msra.gmra.mxu0 %v3004_v10  ;;  %1954 = vmatmul.mubr.f32.vlgmr.msra.gmra.mxu1 %v3004_v10 }
 0x2b6   : > { %1235 = vmatpush1.msra.mxu0 %v2646_v6  ;;  %1957 = vmatpush3.msra.mxu1 %v2780_v45  ;;  %v3248_v6 = vld [vmem:[#allocation30_spill] sm:$0xff] }
 0x2b7   : > { %1236 = vmatprep.subr.mxu0 %v2650_v9  ;;  %1958 = vmatprep.subr.mxu1 %v3237_v60  ;;  %v3249_v9 = vld [vmem:[#allocation25_spill] sm:$0xff] }
 0x2b8   : > { %1237 = vmatpush1.msra.mxu0 %v2653_v11  ;;  %1959 = vmatpush3.msra.mxu1 %v2786_v47  ;;  %v3250_v11 = vld [vmem:[#allocation26_spill] sm:$0xff] }
 0x2b9   : > { %1238 = vmatprep.subr.mxu0 %v2655_v12  ;;  %1960 = vmatprep.subr.mxu1 %v3237_v60  ;;  %v3251_v12 = vld [vmem:[#allocation31_spill] sm:$0xff] }
 0x2ba   : > { %1239 = vmatpush1.msra.mxu0 %v2658_v14  ;;  %1961 = vmatpush3.msra.mxu1 %v2791_v49  ;;  %v1420_v14 = vld [vmem:[#allocation13 + $0x78] sm:$0xff]  ;;  %v1419_v49 = vld [vmem:[#allocation13 + $0x70] sm:$0xff] }
 0x2bb   : > { %1240 = vmatprep.subr.mxu0 %v2661_v16  ;;  %1962 = vmatprep.subr.mxu1 %v3237_v60 }
 0x2bc   : > { %1241 = vmatpush1.msra.mxu0 %v2664_v18  ;;  %1963 = vmatpush3.msra.mxu1 %v2797_v51  ;;  %v1418_v51 = vld [vmem:[#allocation13 + $0x68] sm:$0xff] }
 0x2bd   : > { %1242 = vmatprep.subr.mxu0 %v2667_v20  ;;  %1964 = vmatprep.subr.mxu1 %v3237_v60  ;;  %v3252_v20 = vld [vmem:[#allocation34_spill] sm:$0xff] }
 0x2be   : > { %1243 = vmatpush1.msra.mxu0 %v2670_v22  ;;  %1965 = vmatpush3.msra.mxu1 %v2804_v53  ;;  %v1417_v53 = vld [vmem:[#allocation13 + $0x60] sm:$0xff] }
 0x2bf   : > { %1244 = vmatprep.subr.mxu0 %v2673_v24  ;;  %1966 = vmatprep.subr.mxu1 %v3237_v60 }
 0x2c0   : > { %1245 = vmatpush1.msra.mxu0 %v2676_v26  ;;  %1967 = vmatpush3.msra.mxu1 %v2810_v55  ;;  %v1416_v55 = vld [vmem:[#allocation13 + $0x58] sm:$0xff] }
 0x2c1   : > { %1246 = vmatprep.subr.mxu0 %v2679_v28  ;;  %1968 = vmatprep.subr.mxu1 %v3237_v60 }
 0x2c2   : > { %1247 = vmatpush1.msra.mxu0 %v2682_v30  ;;  %1969 = vmatpush3.msra.mxu1 %v2816_v57  ;;  %v3253_v30 = vld [vmem:[#allocation35_spill] sm:$0xff] }
 0x2c3   : > { %1248 = vmatprep.subr.mxu0 %v2685_v32  ;;  %1970 = vmatprep.subr.mxu1 %v3237_v60  ;;  %v1415_v57 = vld [vmem:[#allocation13 + $0x50] sm:$0xff] }
 0x2c4   : > { %1249 = vmatpush1.msra.mxu0 %v2688_v34  ;;  %1971 = vmatpush3.msra.mxu1 %v2822_v59  ;;  %v1414_v59 = vld [vmem:[#allocation13 + $0x48] sm:$0xff] }
 0x2c5   : > { %1250 = vmatprep.subr.mxu0 %v2691_v36  ;;  %1972 = vmatprep.subr.mxu1 %v3237_v60 }
 0x2c6   : > { %1251 = vmatpush1.msra.mxu0 %v2694_v38  ;;  %1973 = vmatpush3.msra.mxu1 %v2828_v61  ;;  %v1413_v61 = vld [vmem:[#allocation13 + $0x40] sm:$0xff] }
 0x2c7   : > { %1252 = vmatprep.subr.mxu0 %v2697_v40  ;;  %1974 = vmatprep.subr.mxu1 %v3237_v60 }
 0x2c8   : > { %1253 = vmatpush1.msra.mxu0 %v2700_v42  ;;  %1975 = vmatpush3.msra.mxu1 %v2834_v63  ;;  %v1412_v63 = vld [vmem:[#allocation13 + $0x38] sm:$0xff] }
 0x2c9   : > { %1254 = vmatprep.subr.mxu0 %v2703_v44  ;;  %1976 = vmatprep.subr.mxu1 %v3237_v60 }
 0x2ca   : > { %1255 = vmatpush1.msra.mxu0 %v2706_v46  ;;  %1977 = vmatpush3.msra.mxu1 %v2839_v1  ;;  %v1411_v1 = vld [vmem:[#allocation13 + $0x30] sm:$0xff] }
 0x2cb   : > { %1256 = vmatprep.subr.mxu0 %v2709_v48  ;;  %1978 = vmatprep.subr.mxu1 %v3237_v60 }
 0x2cc   : > { %1257 = vmatpush1.msra.mxu0 %v2712_v50  ;;  %1979 = vmatpush3.msra.mxu1 %v2843_v2  ;;  %v3254_v50 = vld [vmem:[#allocation39_spill] sm:$0xff]  ;;  %v1410_v2 = vld [vmem:[#allocation13 + $0x28] sm:$0xff] }
 0x2cd   : > { %1258 = vmatprep.subr.mxu0 %v2715_v52  ;;  %1980 = vmatprep.subr.mxu1 %v3237_v60 }
 0x2ce   : > { %1259 = vmatpush1.msra.mxu0 %v2718_v54  ;;  %1981 = vmatpush3.msra.mxu1 %v2847_v5  ;;  %v1409_v5 = vld [vmem:[#allocation13 + $0x20] sm:$0xff] }
 0x2cf   : > { %1260 = vmatprep.subr.mxu0 %v2721_v56  ;;  %1982 = vmatprep.subr.mxu1 %v3237_v60 }
 0x2d0   : > { %1261 = vmatpush1.msra.mxu0 %v2724_v58  ;;  %1983 = vmatpush3.msra.mxu1 %v3238_v8 }
 0x2d1   : > { %1262 = vmatprep.subr.mxu0 %v3239_v15  ;;  %1984 = vmatprep.subr.mxu1 %v3237_v60 }
 0x2d2   : > { %1263 = vmatpush1.msra.mxu0 %v3240_v62  ;;  %1985 = vmatpush3.msra.mxu1 %v3248_v6  ;;  %v3255_v62 = vld [vmem:[#allocation36_spill] sm:$0xff] }
 0x2d3   : > { %1264 = vmatprep.subr.mxu0 %v3249_v9  ;;  %1986 = vmatprep.subr.mxu1 %v3237_v60 }
 0x2d4   : > { %1265 = vmatpush1.msra.mxu0 %v3250_v11  ;;  %1298 = vmatprep.mubr.f32.mxu0 %v3237_v60 }
 0x2d5   : > { %1987 = vmatpush3.msra.mxu1 %v3251_v12  ;;  %1988 = vmatprep.mubr.msk.f32.mxu1 %vm2417_vm0, %v3237_v60  ;;  %v1405_v60 = vld [vmem:[#allocation13] sm:$0xff]  ;;  %v3257_v12 = vld [vmem:[#allocation27_spill] sm:$0xff] }
 0x2d6   : > { %1991 = vmatprep.subr.mxu0 %v1420_v14 }
 0x375   : > { %v1131_v16 = vpop.f32.mrf.mxu0  ;;  %v1202_v18 = vpop.f32.mrf.mxu1 }
 0x376   : > { %v1206_v22 = vadd.f32 %v1131_v16, %v3252_v20  ;;  %v1220_v44 = vadd.f32 %v2924_v29, %v1202_v18  ;;  %v3258_v18 = vld [vmem:[#allocation38_spill] sm:$0xff] }
 0x377   : > { %v1955_v24 = vpop.f32.mrf.mxu1  ;;  %v1133_v28 = vpop.f32.mrf.mxu0 }
 0x378   : > { %v1691_v26 = vmul.f32 -1.442695, %v1206_v22  ;;  %v1213_v32 = vadd.f32 %v1133_v28, %v3253_v30  ;;  %v2171_v22 = vld [vmem:[%s2626_s29] sm:$0xff] }
 0x37a   : > { %2151 = vpow2.f32 %v1691_v26  ;;  %v1692_v34 = vmul.f32 -1.442695, %v1213_v32 }
 0x37c   : > { %2153 = vpow2.f32 %v1692_v34 }
 0x387   : > { %v2152_v36 = vpop.eup %2151 }
 0x388   : > { %v1210_v38 = vadd.f32 1.0, %v2152_v36 }
 0x389   : > { %v2154_v40 = vpop.eup %2153 }
 0x38a   : > { %2155 = vrcp.f32 %v1210_v38  ;;  %v1217_v42 = vadd.f32 1.0, %v2154_v40 }
 0x38c   : > { %2157 = vrcp.f32 %v1217_v42 }
 0x397   : > { %v2156_v46 = vpop.eup %2155 }
 0x398   : > { %v1221_v48 = vmul.f32 %v2156_v46, %v1220_v44 }
 0x399   : > { %v2158_v54 = vpop.eup %2157 }
 0x39a   : > { %v1222_v52 = vadd.f32 %v1221_v48, %v3254_v50  ;;  %v1224_v56 = vsub.f32 1.0, %v2158_v54  ;;  %v1226_v45 = vmul.f32 %v2158_v54, %v3004_v10 }
 0x39c   : > { %2159 = vtanh.f32 %v1222_v52 }
 0x3a9   : > { %v2160_v58 = vpop.eup %2159 }
 0x3aa   : > { %v1225_v27 = vmul.f32 %v2160_v58, %v1224_v56 }
 0x3ac   : > { %v3078_v47 = vadd.f32 %v1226_v45, %v1225_v27 }
 0x3ae   : > { %1299 = vmatmul.mubr.f32.vlgmr.msra.gmra.mxu0 %v3078_v47  ;;  %1989 = vmatmul.mubr.f32.vlgmr.msra.gmra.mxu1 %v3078_v47 }
 0x3af   : > { %1992 = vmatpush3.msra.mxu0 %v1420_v14  ;;  %2023 = vmatprep.mubr.f32.mxu0 %v2928_v35  ;;  %v1406_v35 = vld [vmem:[#allocation13 + $0x8] sm:$0xff] }
 0x3b0   : > { %1993 = vmatprep.subr.mxu0 %v1419_v49 }
 0x3b1   : > { %1994 = vmatpush3.msra.mxu0 %v1419_v49 }
 0x3b2   : > { %1995 = vmatprep.subr.mxu0 %v1418_v51 }
 0x3b3   : > { %1996 = vmatpush3.msra.mxu0 %v1418_v51 }
 0x3b4   : > { %1997 = vmatprep.subr.mxu0 %v1417_v53 }
 0x3b5   : > { %1998 = vmatpush3.msra.mxu0 %v1417_v53 }
 0x3b6   : > { %1999 = vmatprep.subr.mxu0 %v1416_v55 }
 0x3b7   : > { %2000 = vmatpush3.msra.mxu0 %v1416_v55 }
 0x3b8   : > { %2001 = vmatprep.subr.mxu0 %v1415_v57 }
 0x3b9   : > { %2002 = vmatpush3.msra.mxu0 %v1415_v57 }
 0x3ba   : > { %2003 = vmatprep.subr.mxu0 %v1414_v59 }
 0x3bb   : > { %2004 = vmatpush3.msra.mxu0 %v1414_v59 }
 0x3bc   : > { %2005 = vmatprep.subr.mxu0 %v1413_v61 }
 0x3bd   : > { %2006 = vmatpush3.msra.mxu0 %v1413_v61 }
 0x3be   : > { %2007 = vmatprep.subr.mxu0 %v1412_v63 }
 0x3bf   : > { %2008 = vmatpush3.msra.mxu0 %v1412_v63 }
 0x3c0   : > { %2009 = vmatprep.subr.mxu0 %v1411_v1 }
 0x3c1   : > { %2010 = vmatpush3.msra.mxu0 %v1411_v1 }
 0x3c2   : > { %2011 = vmatprep.subr.mxu0 %v1410_v2 }
 0x3c3   : > { %2012 = vmatpush3.msra.mxu0 %v1410_v2 }
 0x3c4   : > { %2013 = vmatprep.subr.mxu0 %v1409_v5 }
 0x3c5   : > { %2014 = vmatpush3.msra.mxu0 %v1409_v5 }
 0x3c6   : > { %2015 = vmatprep.subr.mxu0 %v1408_v13 }
 0x3c7   : > { %2016 = vmatpush3.msra.mxu0 %v1408_v13 }
 0x3c8   : > { %2017 = vmatprep.subr.mxu0 %v1407_v0 }
 0x3c9   : > { %2018 = vmatpush3.msra.mxu0 %v1407_v0 }
 0x3ca   : > { %2019 = vmatprep.subr.mxu0 %v1406_v35 }
 0x3cb   : > { %2020 = vmatpush3.msra.mxu0 %v1406_v35 }
 0x3cc   : > { %2021 = vmatprep.subr.mxu0 %v1405_v60 }
 0x3cd   : > { %2022 = vmatpush3.msra.mxu0 %v1405_v60 }
 0x3ce   : > { %2024 = vmatmul.mubr.f32.vlgmr.msra.gmra.mxu0 %v3004_v10 }
 0x3cf   : > { %2026 = vmatprep.mubr.f32.mxu0 %v3078_v47 }
 0x46e   : > { %v1300_v8 = vpop.f32.mrf.mxu0  ;;  %v1371_v15 = vpop.f32.mrf.mxu1 }
 0x46f   : > { %v1375_v21 = vadd.f32 %v1300_v8, %v3255_v62  ;;  %v1389_v19 = vadd.f32 %v2924_v29, %v1371_v15 }
 0x470   : > { %v1990_v33 = vpop.f32.mrf.mxu1  ;;  %v1302_v4 = vpop.f32.mrf.mxu0 }
 0x471   : > { %v1693_v39 = vmul.f32 -1.442695, %v1375_v21  ;;  %v1382_v17 = vadd.f32 %v1302_v4, %v3256_v7 }
 0x473   : > { %2161 = vpow2.f32 %v1693_v39  ;;  %v1694_v23 = vmul.f32 -1.442695, %v1382_v17 }
 0x475   : > { %2163 = vpow2.f32 %v1694_v23 }
 0x480   : > { %v2162_v41 = vpop.eup %2161 }
 0x481   : > { %v1379_v25 = vadd.f32 1.0, %v2162_v41 }
 0x482   : > { %v2164_v31 = vpop.eup %2163 }
 0x483   : > { %2165 = vrcp.f32 %v1379_v25  ;;  %v1386_v37 = vadd.f32 1.0, %v2164_v31 }
 0x485   : > { %2167 = vrcp.f32 %v1386_v37 }
 0x48e   : > { %v2025_v43 = vpop.f32.mrf.mxu0 }
 0x48f   : > { %v1500_v10 = vadd.f32 %v2025_v43, %v1695_v3 }
 0x490   : > { %v2166_v6 = vpop.eup %2165  ;;  %v1494_v9 = vpop.f32.mrf.mxu0 }
 0x491   : > { %v1390_v11 = vmul.f32 %v2166_v6, %v1389_v19  ;;  %v1514_v14 = vadd.f32 %v1500_v10, %v3257_v12  ;;  %v1495_v16 = vadd.f32 %v1695_v3, %v1494_v9 }
 0x492   : > { %v2168_v26 = vpop.eup %2167 }
 0x493   : > { %v1391_v20 = vadd.f32 %v1390_v11, %v3258_v18  ;;  %1518 = vst [vmem:[%s2640_s17 + $0x8] sm:$0xff] %v1514_v14  ;;  %v1513_v24 = vadd.f32 %v2171_v22, %v1495_v16  ;;  %v1393_v28 = vsub.f32 1.0, %v2168_v26  ;;  %v1395_v32 = vmul.f32 %v2168_v26, %v3078_v47 }
 0x495   : > { %2169 = vtanh.f32 %v1391_v20  ;;  %1517 = vst [vmem:[%s2640_s17] sm:$0xff] %v1513_v24 }
 0x4a2   : > { %v2170_v30 = vpop.eup %2169 }
 0x4a3   : > { %v1394_v29 = vmul.f32 %v2170_v30, %v1393_v28 }
 0x4a5   : > { %v1396_v34 = vadd.f32 %v1395_v32, %v1394_v29 }
 0x4a7   : > { %1399 = vst [vmem:[#allocation2] sm:$0xff] %v1396_v34  ;;  %2027 = vmatmul.mubr.f32.gmra.mxu0 %v1396_v34  ;;  %1400 = vst [vmem:[#allocation15] sm:$0xff] %v1396_v34 }
 0x4a8   : > { %2318 = shalt.err (!%p2315_p11)
}
 0x4a9   : > { %p3260_p6 = pmov %p3259_p10  ;;  %s1704_s22 = sshll.u32 %s2493_s13, 9  ;;  %v3261_v42 = vld [vmem:[#allocation28_spill] sm:$0xff]  ;;  %v2172_v48 = vld [vmem:[%s2626_s29 + $0x10] sm:$0xff] }
 0x4aa   : > { %s1535_s15 = sshll.u32 %s2640_s17, 4  ;;  %s3110_s14 = scalar_lea.hbm %s3170_s8, %s1704_s22  ;;  %s3112_s15 = int_to_ptr.vmem [resolvable:$true] %s1535_s15 }
 0x4ab   : > { %2049 = dma.vmem_to_hbm [thread:$0]  (%p3260_p6), %s1550_s26, 128, %s3171_s9, [#allocation16]  }
 0x4ac   : > { %s1522_s19 = scalar_lea.sflag [#allocation7], %s2622_s2  ;;  %s2329_s21 = scalar_lea.vmem %s3112_s15, 512 }
 0x4ad   : > { %p2330_p12 = scmp.ne.s32.totalorder %s3112_s15, %s2329_s21  ;;  %p3262_p3 = scmp.ne.s32.totalorder %s3208_s20, 0 }
 0x4ae   : > { %s2419_s25 = smov [#allocation14]  }
 0x4af   : > { %p2331_p8 = pnand %p2330_p12, %p3262_p3  ;;  %s2333_s26 = sshll.u32 %s2419_s25, 4  ;;  %s2334_s26 = int_to_ptr.vmem [resolvable:$false] %s2333_s26 }
 0x4b0   : > { %s2335_s1 = scalar_lea.vmem %s2334_s26, 1024  ;;  %p2336_p13 = scmp.lt.s32.totalorder %s3112_s15, %s2334_s26 }
 0x4b1   : > { %p2332_p1 = pneg %p2331_p8  ;;  %p2337_p2 = scmp.lt.s32.totalorder %s2335_s1, %s2329_s21 }
 0x4b3   : > { %p2338_p10 = por %p2337_p2, %p2336_p13 }
 0x4b5   : > { %p2339_p5 = pnand %p2338_p10, %p2332_p1 }
 0x567   : > { %v2028_v36 = vpop.f32.mrf.mxu0 }
 0x568   : > { %v1510_v38 = vadd.f32 %v2028_v36, %v1695_v3 }
 0x569   : > { %v1504_v40 = vpop.f32.mrf.mxu0 }
 0x56a   : > { %v1516_v44 = vadd.f32 %v1510_v38, %v3261_v42  ;;  %v1505_v46 = vadd.f32 %v1695_v3, %v1504_v40 }
 0x56c   : > { %1520 = vst [vmem:[%s2640_s17 + $0x18] sm:$0xff] %v1516_v44  ;;  %v1515_v50 = vadd.f32 %v2172_v48, %v1505_v46 }
 0x56e   : > { %1519 = vst [vmem:[%s2640_s17 + $0x10] sm:$0xff] %v1515_v50 }
 0x56f   : > { %2342 = shalt.err (!%p2339_p5)
}
 0x570   : > { %s2343_s29 = scalar_lea.hbm %s3110_s14, 512  ;;  %s2347_s3 = scalar_lea.hbm %s3170_s8, 1024 }
 0x571   : > { %p2344_p4 = scmp.ne.s32.totalorder %s3110_s14, %s2343_s29  ;;  %p2348_p0 = scmp.lt.s32.totalorder %s3110_s14, %s3170_s8 }
 0x572   : > { %p2349_p11 = scmp.lt.s32.totalorder %s2347_s3, %s2343_s29 }
 0x573   : > { %p2345_p9 = pnand %p2344_p4, %p3262_p3 }
 0x574   : > { %p2350_p6 = por %p2349_p11, %p2348_p0 }
 0x575   : > { %p2346_p7 = pneg %p2345_p9 }
 0x577   : > { %p2351_p12 = pnand %p2350_p6, %p2346_p7 }
 0x579   : > { %2354 = shalt.err (!%p2351_p12)
}
 0x57a   : > { %s2420_s24 = smov 128   ;;  %s2421_s21 = smov 8  }
 0x57b   : > { %2047 = dma.vmem_to_hbm [thread:$0]  (%p3262_p3), %s3112_s15, 512, %s3110_s14, %s1522_s19, %s2420_s24, %s2420_s24, %s2421_s21  }
 0x57c   : > { %p3263_p8 = scmp.eq.s32.totalorder %s2493_s13, 1 }
 0x57e   : > { %2384 = dma.done.wait (%p3263_p8), [#allocation16], 128   ;;  %p3264_p1 = pmov %p3263_p8 }
 0x580   : > { %2386 = vsyncadd (%p3264_p1), [#allocation16], 4294967168 }
 0x581 PF: > { %s1565_s25 = sand.u32 1, %s2393_s30   ;;  %p3265_p13 = scmp.ne.s32.totalorder %s3201_s16, 0 }
 0x582   : > { %p3266_p2 = scmp.ge.s32.totalorder %s2405_s12, 2  ;;  %s1566_s26 = scalar_lea.sflag [#allocation7], %s1565_s25 }
 0x584   : > { %p2071_p10 = pnand %p3266_p2, %p3265_p13 }
 0x586   : > { %p2072_p5 = pneg %p2071_p10 }
 0x588   : > { %2388 = dma.done.wait (%p2072_p5), %s1566_s26, 512  }
 0x589   : > { %2390 = vsyncadd (%p2072_p5), %s1566_s26, 4294966784  ;;  %p26_p3 = scmp.ge.s32.totalorder %s2564_s18, 4   ;;  %s3267_s30 = smov %s2397_s10 }
 0x58a   : > { %s3268_s10 = smov %s2401_s11  ;;  %s3269_s11 = smov %s2573_s23 }
 0x58b   : > { %s3270_s12 = smov %s2564_s18  ;;  %28 = sbr.rel (!%p26_p3) target bundleno = 12 (0xc), region = 131 }
 0x590   :  { %1571 = vsyncpa [#allocation6], 1 }
 0x591   :  { %1573 = vsyncpa [#allocation6 + $0x1], 1 }
 0x592   :  { %1574 = vsyncpa [#allocation9], 1 }
 0x593   :  { %1575 = vsyncpa [#allocation12], 1 }
 0x594   :  { %1576 = vsyncpa [#allocation7], 1 }
 0x595   :  { %1578 = vsyncpa [#allocation7 + $0x1], 1 }
 0x596   :  { %1579 = vsyncpa [#allocation16], 1 }

</bundles_post_ra>
